<compile_context>
chip_gen: v7x
topology: tpu7x:2x2x1
jax: 0.10.0
libtpu: 0.0.40
codegen_flags: <defaults>
</compile_context>

<pallas_src>
import functools

import numpy as np
import jax
import jax.numpy as jnp
from jax.experimental import pallas as pl
from jax.experimental.pallas import tpu as pltpu

LOSS_WEIGHT = 0.001
_LANE = 128
_BLOCKDIAG_MAX = 1024          # use block-diagonal H-DFT while TB*C*H <= this
_VMEM_BUDGET = 24 * 1024 * 1024


# ---------------------------------------------------------------------------
# Trace-time numpy helpers (DFT matrices, block-diagonal construction)
# ---------------------------------------------------------------------------
def _round_up(n, m):
    return ((n + m - 1) // m) * m


def _dft_matrix(n, n_out=None, pad_to=None):
    """Real/imag parts of the (n, n_out[->pad_to]) DFT matrix exp(-2*pi*i*j*k/n)."""
    n_out = n if n_out is None else n_out
    j = np.arange(n, dtype=np.float64)[:, None]
    k = np.arange(n_out, dtype=np.float64)[None, :]
    ang = -2.0 * np.pi * j * k / float(n)
    re, im = np.cos(ang), np.sin(ang)
    if pad_to is not None and pad_to > n_out:
        re = np.pad(re, ((0, 0), (0, pad_to - n_out)))
        im = np.pad(im, ((0, 0), (0, pad_to - n_out)))
    return re, im


def _block_diag(m, g):
    n0, n1 = m.shape
    out = np.zeros((g * n0, g * n1), dtype=m.dtype)
    for i in range(g):
        out[i * n0:(i + 1) * n0, i * n1:(i + 1) * n1] = m
    return out


# ---------------------------------------------------------------------------
# Pallas kernel
# ---------------------------------------------------------------------------
def _dot(a, b):
    # Single-pass bf16 MXU matmul with f32 accumulation.
    return jnp.dot(a, b, preferred_element_type=jnp.float32)


def _weighted_sum(vals, weights):
    """VPU scalar-weighted sum over a tiny static axis (skips ~0 weights)."""
    acc = None
    for v, w in zip(vals, weights):
        w = float(w)
        if abs(w) < 1e-12:
            continue
        term = v if w == 1.0 else v * jnp.float32(w)
        acc = term if acc is None else acc + term
    if acc is None:
        acc = jnp.zeros_like(vals[0])
    return acc


def _fft_loss_kernel(x1_ref, x2_ref, dwr_ref, dwi_ref, dws_ref,
                     bhr_ref, bhi_ref, bhs_ref, out_ref, acc_ref, *,
                     dc_re, dc_im, tb, c, h, inv_wf, final_scale, blockdiag):
    step = pl.program_id(0)
    nsteps = pl.num_programs(0)

    @pl.when(step == 0)
    def _():
        acc_ref[...] = jnp.zeros_like(acc_ref)

    # Fused subtract: only the difference is transformed (DFT linearity).
    d = x1_ref[...] - x2_ref[...]                         # (TB, C, H, W) f32

    # ---- stage 1: tiny full DFT over C on the VPU (scalar weights), with all
    # (batch, out-channel) blocks stacked along the sublane (M) axis ----------
    rows_r, rows_i = [], []
    for b in range(tb):
        d_b = [d[b, cc] for cc in range(c)]               # C x (H, W) f32
        for kc in range(c):
            rows_r.append(_weighted_sum(d_b, dc_re[:, kc]))
            rows_i.append(_weighted_sum(d_b, dc_im[:, kc]))
    cr = jnp.concatenate(rows_r, axis=0)                  # (G*H, W) f32
    ci = jnp.concatenate(rows_i, axis=0)                  # (G*H, W) f32

    # ---- stage 2: rDFT over W, Gauss 3-mult complex matmul on the MXU -------
    cr_b = cr.astype(jnp.bfloat16)
    ci_b = ci.astype(jnp.bfloat16)
    cs_b = (cr + ci).astype(jnp.bfloat16)                 # VPU add in f32
    u1 = _dot(cr_b, dwr_ref[...])                         # (G*H, Wfp) f32
    u2 = _dot(ci_b, dwi_ref[...])
    u3 = _dot(cs_b, dws_ref[...])
    vr = u1 - u2                                          # real part
    vi = u3 - u1 - u2                                     # imag part

    inv_wf = jnp.float32(inv_wf)

    # ---- stage 3: full DFT over H (Gauss 3-mult) + loss reduction -----------
    if blockdiag:
        # One set of lane/sublane-dense matmuls via a block-diagonal H-DFT.
        vr_b = vr.astype(jnp.bfloat16)
        vi_b = vi.astype(jnp.bfloat16)
        vs_b = (vr + vi).astype(jnp.bfloat16)
        t1 = _dot(bhr_ref[...], vr_b)                     # (G*H, Wfp) f32
        t2 = _dot(bhi_ref[...], vi_b)
        t3 = _dot(bhs_ref[...], vs_b)
        zr = t1 - t2
        zi = t3 - t1 - t2
        sr = jnp.sum(zr * zr, axis=-1, keepdims=True) * inv_wf
        si = jnp.sum(zi * zi, axis=-1, keepdims=True) * inv_wf
        per_row = jnp.sqrt(sr) + jnp.sqrt(si)             # (G*H, 1)
        total = jnp.sum(per_row, axis=0, keepdims=True)   # (1, 1)
    else:
        # Large H: per-(batch, channel) blocks, no wasted block-diag FLOPs.
        dh_re, dh_im, dh_sum = bhr_ref[...], bhi_ref[...], bhs_ref[...]
        total = jnp.zeros((1, 1), jnp.float32)
        for g in range(tb * c):
            vr_g = vr[g * h:(g + 1) * h, :]
            vi_g = vi[g * h:(g + 1) * h, :]
            t1 = _dot(dh_re, vr_g.astype(jnp.bfloat16))
            t2 = _dot(dh_im, vi_g.astype(jnp.bfloat16))
            t3 = _dot(dh_sum, (vr_g + vi_g).astype(jnp.bfloat16))
            zr = t1 - t2
            zi = t3 - t1 - t2
            sr = jnp.sum(zr * zr, axis=-1, keepdims=True) * inv_wf
            si = jnp.sum(zi * zi, axis=-1, keepdims=True) * inv_wf
            total = total + jnp.sum(jnp.sqrt(sr) + jnp.sqrt(si),
                                    axis=0, keepdims=True)

    acc_ref[...] += total

    @pl.when(step == nsteps - 1)
    def _():
        out_ref[...] = acc_ref[...] * jnp.float32(final_scale)


# ---------------------------------------------------------------------------
# Wrapper
# ---------------------------------------------------------------------------
def _estimate_vmem(tb, c, h, w, wf_pad):
    g = tb * c
    dh_dim = g * h if g * h <= _BLOCKDIAG_MAX else h
    return (2 * 2 * tb * c * h * w * 4            # x1/x2, double-buffered
            + 12 * g * h * max(w, wf_pad) * 4     # f32 stage intermediates
            + 3 * 2 * dh_dim * dh_dim * 2         # H-DFT matrices (bf16, 2 bufs)
            + 3 * 2 * w * wf_pad * 2)             # W-DFT matrices (bf16, 2 bufs)


def _pick_tb(b, c, h, w, wf_pad):
    best = 1
    for tb in range(1, b + 1):
        if b % tb:
            continue
        if _estimate_vmem(tb, c, h, w, wf_pad) <= _VMEM_BUDGET:
            best = tb
    return best


def fft_loss(img1, img2, loss_weight=LOSS_WEIGHT):
    b, c, h, w = img1.shape
    wf = w // 2 + 1
    wf_pad = _round_up(wf, _LANE)

    tb = _pick_tb(b, c, h, w, wf_pad)      # batch elements per grid step
    nsteps = b // tb
    g = tb * c
    blockdiag = (g * h) <= _BLOCKDIAG_MAX

    # DFT matrices (deterministic numpy, trace time).
    dc_re, dc_im = _dft_matrix(c)                         # tiny, stays scalar
    dh_re, dh_im = _dft_matrix(h)
    dw_re, dw_im = _dft_matrix(w, wf, pad_to=wf_pad)
    dh_sum = dh_re + dh_im                                # Gauss combos
    dw_sum = dw_re + dw_im
    if blockdiag:
        dh_re = _block_diag(dh_re, g)
        dh_im = _block_diag(dh_im, g)
        dh_sum = _block_diag(dh_sum, g)

    def to_bf16(m):
        return jnp.asarray(m.astype(np.float32), dtype=jnp.bfloat16)

    dwr, dwi, dws = to_bf16(dw_re), to_bf16(dw_im), to_bf16(dw_sum)
    bhr, bhi, bhs = to_bf16(dh_re), to_bf16(dh_im), to_bf16(dh_sum)

    img1 = img1.astype(jnp.float32)
    img2 = img2.astype(jnp.float32)

    kernel = functools.partial(
        _fft_loss_kernel,
        dc_re=dc_re, dc_im=dc_im, tb=tb, c=c, h=h,
        inv_wf=1.0 / float(wf),                           # TRUE Wf, not padded
        final_scale=float(loss_weight) / float(2 * b * c * h),
        blockdiag=blockdiag)

    img_spec = pl.BlockSpec((tb, c, h, w), lambda i: (i, 0, 0, 0))

    def mat_spec(arr):
        return pl.BlockSpec(arr.shape, lambda i: (0, 0))

    kdim = bhr.shape[0] if blockdiag else h
    flops = nsteps * 3 * 2 * g * h * wf_pad * (w + kdim)
    cost = pl.CostEstimate(
        flops=int(flops),
        transcendentals=int(2 * b * c * h),
        bytes_accessed=int(2 * b * c * h * w * 4
                           + 3 * 2 * (dwr.size + bhr.size) + 4))

    out = pl.pallas_call(
        kernel,
        grid=(nsteps,),
        in_specs=[img_spec, img_spec,
                  mat_spec(dwr), mat_spec(dwi), mat_spec(dws),
                  mat_spec(bhr), mat_spec(bhi), mat_spec(bhs)],
        out_specs=pl.BlockSpec((1, 1), lambda i: (0, 0)),
        out_shape=jax.ShapeDtypeStruct((1, 1), jnp.float32),
        scratch_shapes=[pltpu.VMEM((1, 1), jnp.float32)],
        compiler_params=pltpu.CompilerParams(
            dimension_semantics=("arbitrary",),           # accumulator axis
            vmem_limit_bytes=32 * 1024 * 1024),
        cost_estimate=cost,
    )(img1, img2, dwr, dwi, dws, bhr, bhi, bhs)
    return out[0, 0]


# ---------------------------------------------------------------------------
# High-precision host reference (numpy, float64)
# ---------------------------------------------------------------------------
def fft_loss_reference(img1, img2, loss_weight=LOSS_WEIGHT):
    a = np.asarray(img1, dtype=np.float64)
    b = np.asarray(img2, dtype=np.float64)
    f1 = np.fft.rfftn(a, axes=(-3, -2, -1))
    f2 = np.fft.rfftn(b, axes=(-3, -2, -1))
    d = np.stack([f1.real - f2.real, f1.imag - f2.imag])
    return loss_weight * np.sqrt((d ** 2).mean(-1)).mean()


# ---------------------------------------------------------------------------
if __name__ == "__main__":
    key = jax.random.PRNGKey(0)
    k1, k2 = jax.random.split(key)
    B, C, H, W = 2, 4, 16, 16
    img1 = jax.random.normal(k1, (B, C, H, W), dtype=jnp.float32)
    img2 = jax.random.normal(k2, (B, C, H, W), dtype=jnp.float32)

    loss = jax.block_until_ready(fft_loss(img1, img2))
    ref = float(fft_loss_reference(img1, img2))

    assert np.isfinite(float(loss))
    assert np.allclose(float(loss), ref, rtol=2e-2, atol=1e-6), (float(loss), ref)

    print("KERNEL_OK")
</pallas_src>

<mosaic_0001>
module attributes {stable_mosaic.version = 11 : i64} {
  func.func @_fft_loss_kernel(%arg0: i32, %arg1: memref<2x4x16x16xf32, #tpu.memory_space<vmem>>, %arg2: memref<2x4x16x16xf32, #tpu.memory_space<vmem>>, %arg3: memref<16x128xbf16, #tpu.memory_space<vmem>>, %arg4: memref<16x128xbf16, #tpu.memory_space<vmem>>, %arg5: memref<16x128xbf16, #tpu.memory_space<vmem>>, %arg6: memref<128x128xbf16, #tpu.memory_space<vmem>>, %arg7: memref<128x128xbf16, #tpu.memory_space<vmem>>, %arg8: memref<128x128xbf16, #tpu.memory_space<vmem>>, %arg9: memref<1x1xf32, #tpu.memory_space<vmem>>, %arg10: memref<1x1xf32, #tpu.memory_space<vmem>>) attributes {dimension_semantics = [#tpu.dimension_semantics<arbitrary>], iteration_bounds = array<i64: 1>, scalar_prefetch = 0 : i64, scratch_operands = 1 : i64, tpu.core_type = #tpu.core_type<tc>, window_params = [{transform_indices = @transform_0, window_bounds = array<i64: 2, 4, 16, 16>}, {transform_indices = @transform_1, window_bounds = array<i64: 2, 4, 16, 16>}, {pipeline_mode = #tpu.pipeline_mode<synchronous>, transform_indices = @transform_2, window_bounds = array<i64: 16, 128>}, {pipeline_mode = #tpu.pipeline_mode<synchronous>, transform_indices = @transform_3, window_bounds = array<i64: 16, 128>}, {pipeline_mode = #tpu.pipeline_mode<synchronous>, transform_indices = @transform_4, window_bounds = array<i64: 16, 128>}, {pipeline_mode = #tpu.pipeline_mode<synchronous>, transform_indices = @transform_5, window_bounds = array<i64: 128, 128>}, {pipeline_mode = #tpu.pipeline_mode<synchronous>, transform_indices = @transform_6, window_bounds = array<i64: 128, 128>}, {pipeline_mode = #tpu.pipeline_mode<synchronous>, transform_indices = @transform_7, window_bounds = array<i64: 128, 128>}, {pipeline_mode = #tpu.pipeline_mode<synchronous>, transform_indices = @transform_8, window_bounds = array<i64: 1, 1>}]} {
    %c0_i32 = arith.constant 0 : i32
    %0 = arith.cmpi eq, %arg0, %c0_i32 : i32
    %1 = arith.extui %0 : i1 to i32
    %c0_i32_0 = arith.constant 0 : i32
    %2 = arith.cmpi ne, %1, %c0_i32_0 : i32
    scf.if %2 {
      %cst_52 = arith.constant 0.000000e+00 : f32
      %119 = vector.broadcast %cst_52 : f32 to vector<1x1xf32>
      %c0_53 = arith.constant 0 : index
      %c0_54 = arith.constant 0 : index
      %120 = vector.load %arg10[%c0_53, %c0_54] : memref<1x1xf32, #tpu.memory_space<vmem>>, vector<1x1xf32>
      tpu.vector_store %arg10[%c0_53, %c0_54], %119 {strides = array<i32>} : memref<1x1xf32, #tpu.memory_space<vmem>>, vector<1x1xf32>,
    } else {
    }
    %c0 = arith.constant 0 : index
    %c0_1 = arith.constant 0 : index
    %c0_2 = arith.constant 0 : index
    %c0_3 = arith.constant 0 : index
    %3 = vector.load %arg1[%c0, %c0_1, %c0_2, %c0_3] : memref<2x4x16x16xf32, #tpu.memory_space<vmem>>, vector<2x4x16x16xf32>
    %c0_4 = arith.constant 0 : index
    %c0_5 = arith.constant 0 : index
    %c0_6 = arith.constant 0 : index
    %c0_7 = arith.constant 0 : index
    %4 = vector.load %arg2[%c0_4, %c0_5, %c0_6, %c0_7] : memref<2x4x16x16xf32, #tpu.memory_space<vmem>>, vector<2x4x16x16xf32>
    %5 = arith.subf %3, %4 : vector<2x4x16x16xf32>
    %6 = vector.extract_strided_slice %5 {offsets = [0, 0, 0, 0], sizes = [1, 1, 16, 16], strides = [1, 1, 1, 1]} : vector<2x4x16x16xf32> to vector<1x1x16x16xf32>
    %7 = vector.shape_cast %6 : vector<1x1x16x16xf32> to vector<16x16xf32>
    %8 = vector.extract_strided_slice %5 {offsets = [0, 1, 0, 0], sizes = [1, 1, 16, 16], strides = [1, 1, 1, 1]} : vector<2x4x16x16xf32> to vector<1x1x16x16xf32>
    %9 = vector.shape_cast %8 : vector<1x1x16x16xf32> to vector<16x16xf32>
    %10 = vector.extract_strided_slice %5 {offsets = [0, 2, 0, 0], sizes = [1, 1, 16, 16], strides = [1, 1, 1, 1]} : vector<2x4x16x16xf32> to vector<1x1x16x16xf32>
    %11 = vector.shape_cast %10 : vector<1x1x16x16xf32> to vector<16x16xf32>
    %12 = vector.extract_strided_slice %5 {offsets = [0, 3, 0, 0], sizes = [1, 1, 16, 16], strides = [1, 1, 1, 1]} : vector<2x4x16x16xf32> to vector<1x1x16x16xf32>
    %13 = vector.shape_cast %12 : vector<1x1x16x16xf32> to vector<16x16xf32>
    %14 = arith.addf %7, %9 : vector<16x16xf32>
    %15 = arith.addf %14, %11 : vector<16x16xf32>
    %16 = arith.addf %15, %13 : vector<16x16xf32>
    %cst = arith.constant 0.000000e+00 : f32
    %17 = vector.broadcast %cst : f32 to vector<16x16xf32>
    %cst_8 = arith.constant -1.000000e+00 : f32
    %18 = vector.broadcast %cst_8 : f32 to vector<16x16xf32>
    %19 = arith.mulf %11, %18 : vector<16x16xf32>
    %20 = arith.addf %7, %19 : vector<16x16xf32>
    %cst_9 = arith.constant -1.000000e+00 : f32
    %21 = vector.broadcast %cst_9 : f32 to vector<16x16xf32>
    %22 = arith.mulf %9, %21 : vector<16x16xf32>
    %23 = arith.addf %22, %13 : vector<16x16xf32>
    %cst_10 = arith.constant -1.000000e+00 : f32
    %24 = vector.broadcast %cst_10 : f32 to vector<16x16xf32>
    %25 = arith.mulf %9, %24 : vector<16x16xf32>
    %26 = arith.addf %7, %25 : vector<16x16xf32>
    %27 = arith.addf %26, %11 : vector<16x16xf32>
    %cst_11 = arith.constant -1.000000e+00 : f32
    %28 = vector.broadcast %cst_11 : f32 to vector<16x16xf32>
    %29 = arith.mulf %13, %28 : vector<16x16xf32>
    %30 = arith.addf %27, %29 : vector<16x16xf32>
    %cst_12 = arith.constant 0.000000e+00 : f32
    %31 = vector.broadcast %cst_12 : f32 to vector<16x16xf32>
    %cst_13 = arith.constant -1.000000e+00 : f32
    %32 = vector.broadcast %cst_13 : f32 to vector<16x16xf32>
    %33 = arith.mulf %11, %32 : vector<16x16xf32>
    %34 = arith.addf %7, %33 : vector<16x16xf32>
    %cst_14 = arith.constant -1.000000e+00 : f32
    %35 = vector.broadcast %cst_14 : f32 to vector<16x16xf32>
    %36 = arith.mulf %13, %35 : vector<16x16xf32>
    %37 = arith.addf %9, %36 : vector<16x16xf32>
    %38 = vector.extract_strided_slice %5 {offsets = [1, 0, 0, 0], sizes = [1, 1, 16, 16], strides = [1, 1, 1, 1]} : vector<2x4x16x16xf32> to vector<1x1x16x16xf32>
    %39 = vector.shape_cast %38 : vector<1x1x16x16xf32> to vector<16x16xf32>
    %40 = vector.extract_strided_slice %5 {offsets = [1, 1, 0, 0], sizes = [1, 1, 16, 16], strides = [1, 1, 1, 1]} : vector<2x4x16x16xf32> to vector<1x1x16x16xf32>
    %41 = vector.shape_cast %40 : vector<1x1x16x16xf32> to vector<16x16xf32>
    %42 = vector.extract_strided_slice %5 {offsets = [1, 2, 0, 0], sizes = [1, 1, 16, 16], strides = [1, 1, 1, 1]} : vector<2x4x16x16xf32> to vector<1x1x16x16xf32>
    %43 = vector.shape_cast %42 : vector<1x1x16x16xf32> to vector<16x16xf32>
    %44 = vector.extract_strided_slice %5 {offsets = [1, 3, 0, 0], sizes = [1, 1, 16, 16], strides = [1, 1, 1, 1]} : vector<2x4x16x16xf32> to vector<1x1x16x16xf32>
    %45 = vector.shape_cast %44 : vector<1x1x16x16xf32> to vector<16x16xf32>
    %46 = arith.addf %39, %41 : vector<16x16xf32>
    %47 = arith.addf %46, %43 : vector<16x16xf32>
    %48 = arith.addf %47, %45 : vector<16x16xf32>
    %cst_15 = arith.constant 0.000000e+00 : f32
    %49 = vector.broadcast %cst_15 : f32 to vector<16x16xf32>
    %cst_16 = arith.constant -1.000000e+00 : f32
    %50 = vector.broadcast %cst_16 : f32 to vector<16x16xf32>
    %51 = arith.mulf %43, %50 : vector<16x16xf32>
    %52 = arith.addf %39, %51 : vector<16x16xf32>
    %cst_17 = arith.constant -1.000000e+00 : f32
    %53 = vector.broadcast %cst_17 : f32 to vector<16x16xf32>
    %54 = arith.mulf %41, %53 : vector<16x16xf32>
    %55 = arith.addf %54, %45 : vector<16x16xf32>
    %cst_18 = arith.constant -1.000000e+00 : f32
    %56 = vector.broadcast %cst_18 : f32 to vector<16x16xf32>
    %57 = arith.mulf %41, %56 : vector<16x16xf32>
    %58 = arith.addf %39, %57 : vector<16x16xf32>
    %59 = arith.addf %58, %43 : vector<16x16xf32>
    %cst_19 = arith.constant -1.000000e+00 : f32
    %60 = vector.broadcast %cst_19 : f32 to vector<16x16xf32>
    %61 = arith.mulf %45, %60 : vector<16x16xf32>
    %62 = arith.addf %59, %61 : vector<16x16xf32>
    %cst_20 = arith.constant 0.000000e+00 : f32
    %63 = vector.broadcast %cst_20 : f32 to vector<16x16xf32>
    %cst_21 = arith.constant -1.000000e+00 : f32
    %64 = vector.broadcast %cst_21 : f32 to vector<16x16xf32>
    %65 = arith.mulf %43, %64 : vector<16x16xf32>
    %66 = arith.addf %39, %65 : vector<16x16xf32>
    %cst_22 = arith.constant -1.000000e+00 : f32
    %67 = vector.broadcast %cst_22 : f32 to vector<16x16xf32>
    %68 = arith.mulf %45, %67 : vector<16x16xf32>
    %69 = arith.addf %41, %68 : vector<16x16xf32>
    %70 = tpu.concatenate %16, %20, %30, %34, %48, %52, %62, %66 in 0 : vector<16x16xf32>, vector<16x16xf32>, vector<16x16xf32>, vector<16x16xf32>, vector<16x16xf32>, vector<16x16xf32>, vector<16x16xf32>, vector<16x16xf32> -> vector<128x16xf32>
    %71 = tpu.concatenate %17, %23, %31, %37, %49, %55, %63, %69 in 0 : vector<16x16xf32>, vector<16x16xf32>, vector<16x16xf32>, vector<16x16xf32>, vector<16x16xf32>, vector<16x16xf32>, vector<16x16xf32>, vector<16x16xf32> -> vector<128x16xf32>
    %72 = arith.truncf %70 : vector<128x16xf32> to vector<128x16xbf16>
    %73 = arith.truncf %71 : vector<128x16xf32> to vector<128x16xbf16>
    %74 = arith.addf %70, %71 : vector<128x16xf32>
    %75 = arith.truncf %74 : vector<128x16xf32> to vector<128x16xbf16>
    %c0_23 = arith.constant 0 : index
    %c0_24 = arith.constant 0 : index
    %76 = vector.load %arg3[%c0_23, %c0_24] : memref<16x128xbf16, #tpu.memory_space<vmem>>, vector<16x128xbf16>
    %cst_25 = arith.constant dense<0.000000e+00> : vector<128x128xf32>
    %77 = tpu.matmul %72, %76, %cst_25 {dimension_numbers = #tpu.dot_dimension_numbers<[1], [0], [0], [1], [0, 0, 1, 1], [], []>} : vector<128x16xbf16>, vector<16x128xbf16>, vector<128x128xf32> -> vector<128x128xf32>
    %c0_26 = arith.constant 0 : index
    %c0_27 = arith.constant 0 : index
    %78 = vector.load %arg4[%c0_26, %c0_27] : memref<16x128xbf16, #tpu.memory_space<vmem>>, vector<16x128xbf16>
    %cst_28 = arith.constant dense<0.000000e+00> : vector<128x128xf32>
    %79 = tpu.matmul %73, %78, %cst_28 {dimension_numbers = #tpu.dot_dimension_numbers<[1], [0], [0], [1], [0, 0, 1, 1], [], []>} : vector<128x16xbf16>, vector<16x128xbf16>, vector<128x128xf32> -> vector<128x128xf32>
    %c0_29 = arith.constant 0 : index
    %c0_30 = arith.constant 0 : index
    %80 = vector.load %arg5[%c0_29, %c0_30] : memref<16x128xbf16, #tpu.memory_space<vmem>>, vector<16x128xbf16>
    %cst_31 = arith.constant dense<0.000000e+00> : vector<128x128xf32>
    %81 = tpu.matmul %75, %80, %cst_31 {dimension_numbers = #tpu.dot_dimension_numbers<[1], [0], [0], [1], [0, 0, 1, 1], [], []>} : vector<128x16xbf16>, vector<16x128xbf16>, vector<128x128xf32> -> vector<128x128xf32>
    %82 = arith.subf %77, %79 : vector<128x128xf32>
    %83 = arith.subf %81, %77 : vector<128x128xf32>
    %84 = arith.subf %83, %79 : vector<128x128xf32>
    %85 = arith.truncf %82 : vector<128x128xf32> to vector<128x128xbf16>
    %86 = arith.truncf %84 : vector<128x128xf32> to vector<128x128xbf16>
    %87 = arith.addf %82, %84 : vector<128x128xf32>
    %88 = arith.truncf %87 : vector<128x128xf32> to vector<128x128xbf16>
    %c0_32 = arith.constant 0 : index
    %c0_33 = arith.constant 0 : index
    %89 = vector.load %arg6[%c0_32, %c0_33] : memref<128x128xbf16, #tpu.memory_space<vmem>>, vector<128x128xbf16>
    %cst_34 = arith.constant dense<0.000000e+00> : vector<128x128xf32>
    %90 = tpu.matmul %89, %85, %cst_34 {dimension_numbers = #tpu.dot_dimension_numbers<[1], [0], [0], [1], [0, 0, 1, 1], [], []>} : vector<128x128xbf16>, vector<128x128xbf16>, vector<128x128xf32> -> vector<128x128xf32>
    %c0_35 = arith.constant 0 : index
    %c0_36 = arith.constant 0 : index
    %91 = vector.load %arg7[%c0_35, %c0_36] : memref<128x128xbf16, #tpu.memory_space<vmem>>, vector<128x128xbf16>
    %cst_37 = arith.constant dense<0.000000e+00> : vector<128x128xf32>
    %92 = tpu.matmul %91, %86, %cst_37 {dimension_numbers = #tpu.dot_dimension_numbers<[1], [0], [0], [1], [0, 0, 1, 1], [], []>} : vector<128x128xbf16>, vector<128x128xbf16>, vector<128x128xf32> -> vector<128x128xf32>
    %c0_38 = arith.constant 0 : index
    %c0_39 = arith.constant 0 : index
    %93 = vector.load %arg8[%c0_38, %c0_39] : memref<128x128xbf16, #tpu.memory_space<vmem>>, vector<128x128xbf16>
    %cst_40 = arith.constant dense<0.000000e+00> : vector<128x128xf32>
    %94 = tpu.matmul %93, %88, %cst_40 {dimension_numbers = #tpu.dot_dimension_numbers<[1], [0], [0], [1], [0, 0, 1, 1], [], []>} : vector<128x128xbf16>, vector<128x128xbf16>, vector<128x128xf32> -> vector<128x128xf32>
    %95 = arith.subf %90, %92 : vector<128x128xf32>
    %96 = arith.subf %94, %90 : vector<128x128xf32>
    %97 = arith.subf %96, %92 : vector<128x128xf32>
    %98 = arith.mulf %95, %95 : vector<128x128xf32>
    %cst_41 = arith.constant dense<0.000000e+00> : vector<128xf32>
    %99 = vector.multi_reduction <add>, %98, %cst_41 [1] : vector<128x128xf32> to vector<128xf32>
    %100 = vector.shape_cast %99 : vector<128xf32> to vector<128x1xf32>
    %cst_42 = arith.constant 0.111111112 : f32
    %101 = vector.broadcast %cst_42 : f32 to vector<128x1xf32>
    %102 = arith.mulf %100, %101 : vector<128x1xf32>
    %103 = arith.mulf %97, %97 : vector<128x128xf32>
    %cst_43 = arith.constant dense<0.000000e+00> : vector<128xf32>
    %104 = vector.multi_reduction <add>, %103, %cst_43 [1] : vector<128x128xf32> to vector<128xf32>
    %105 = vector.shape_cast %104 : vector<128xf32> to vector<128x1xf32>
    %cst_44 = arith.constant 0.111111112 : f32
    %106 = vector.broadcast %cst_44 : f32 to vector<128x1xf32>
    %107 = arith.mulf %105, %106 : vector<128x1xf32>
    %108 = math.sqrt %102 : vector<128x1xf32>
    %109 = math.sqrt %107 : vector<128x1xf32>
    %110 = arith.addf %108, %109 : vector<128x1xf32>
    %cst_45 = arith.constant dense<0.000000e+00> : vector<1xf32>
    %111 = vector.multi_reduction <add>, %110, %cst_45 [0] : vector<128x1xf32> to vector<1xf32>
    %112 = vector.shape_cast %111 : vector<1xf32> to vector<1x1xf32>
    %c0_46 = arith.constant 0 : index
    %c0_47 = arith.constant 0 : index
    %113 = vector.load %arg10[%c0_46, %c0_47] : memref<1x1xf32, #tpu.memory_space<vmem>>, vector<1x1xf32>
    %114 = arith.addf %113, %112 : vector<1x1xf32>
    %c0_48 = arith.constant 0 : index
    %c0_49 = arith.constant 0 : index
    %115 = vector.load %arg10[%c0_48, %c0_49] : memref<1x1xf32, #tpu.memory_space<vmem>>, vector<1x1xf32>
    tpu.vector_store %arg10[%c0_48, %c0_49], %114 {strides = array<i32>} : memref<1x1xf32, #tpu.memory_space<vmem>>, vector<1x1xf32>,
    %c0_i32_50 = arith.constant 0 : i32
    %116 = arith.cmpi eq, %arg0, %c0_i32_50 : i32
    %117 = arith.extui %116 : i1 to i32
    %c0_i32_51 = arith.constant 0 : i32
    %118 = arith.cmpi ne, %117, %c0_i32_51 : i32
    scf.if %118 {
      %c0_52 = arith.constant 0 : index
      %c0_53 = arith.constant 0 : index
      %119 = vector.load %arg10[%c0_52, %c0_53] : memref<1x1xf32, #tpu.memory_space<vmem>>, vector<1x1xf32>
      %cst_54 = arith.constant 3.906250e-06 : f32
      %120 = vector.broadcast %cst_54 : f32 to vector<1x1xf32>
      %121 = arith.mulf %119, %120 : vector<1x1xf32>
      %c0_55 = arith.constant 0 : index
      %c0_56 = arith.constant 0 : index
      %122 = vector.load %arg9[%c0_55, %c0_56] : memref<1x1xf32, #tpu.memory_space<vmem>>, vector<1x1xf32>
      tpu.vector_store %arg9[%c0_55, %c0_56], %121 {strides = array<i32>} : memref<1x1xf32, #tpu.memory_space<vmem>>, vector<1x1xf32>,
    } else {
    }
    return
  }
  func.func @transform_0(%arg0: i32) -> (i32, i32, i32, i32) {
    %c0_i32 = arith.constant 0 : i32
    %c0_i32_0 = arith.constant 0 : i32
    %c0_i32_1 = arith.constant 0 : i32
    %c0_i32_2 = arith.constant 0 : i32
    return %arg0, %c0_i32, %c0_i32_0, %c0_i32_1 : i32, i32, i32, i32
  }
  func.func @transform_1(%arg0: i32) -> (i32, i32, i32, i32) {
    %c0_i32 = arith.constant 0 : i32
    %c0_i32_0 = arith.constant 0 : i32
    %c0_i32_1 = arith.constant 0 : i32
    %c0_i32_2 = arith.constant 0 : i32
    return %arg0, %c0_i32, %c0_i32_0, %c0_i32_1 : i32, i32, i32, i32
  }
  func.func @transform_2(%arg0: i32) -> (i32, i32) {
    %c0_i32 = arith.constant 0 : i32
    %c0_i32_0 = arith.constant 0 : i32
    %c0_i32_1 = arith.constant 0 : i32
    return %c0_i32, %c0_i32_0 : i32, i32
  }
  func.func @transform_3(%arg0: i32) -> (i32, i32) {
    %c0_i32 = arith.constant 0 : i32
    %c0_i32_0 = arith.constant 0 : i32
    %c0_i32_1 = arith.constant 0 : i32
    return %c0_i32, %c0_i32_0 : i32, i32
  }
  func.func @transform_4(%arg0: i32) -> (i32, i32) {
    %c0_i32 = arith.constant 0 : i32
    %c0_i32_0 = arith.constant 0 : i32
    %c0_i32_1 = arith.constant 0 : i32
    return %c0_i32, %c0_i32_0 : i32, i32
  }
  func.func @transform_5(%arg0: i32) -> (i32, i32) {
    %c0_i32 = arith.constant 0 : i32
    %c0_i32_0 = arith.constant 0 : i32
    %c0_i32_1 = arith.constant 0 : i32
    return %c0_i32, %c0_i32_0 : i32, i32
  }
  func.func @transform_6(%arg0: i32) -> (i32, i32) {
    %c0_i32 = arith.constant 0 : i32
    %c0_i32_0 = arith.constant 0 : i32
    %c0_i32_1 = arith.constant 0 : i32
    return %c0_i32, %c0_i32_0 : i32, i32
  }
  func.func @transform_7(%arg0: i32) -> (i32, i32) {
    %c0_i32 = arith.constant 0 : i32
    %c0_i32_0 = arith.constant 0 : i32
    %c0_i32_1 = arith.constant 0 : i32
    return %c0_i32, %c0_i32_0 : i32, i32
  }
  func.func @transform_8(%arg0: i32) -> (i32, i32) {
    %c0_i32 = arith.constant 0 : i32
    %c0_i32_0 = arith.constant 0 : i32
    %c0_i32_1 = arith.constant 0 : i32
    return %c0_i32, %c0_i32_0 : i32, i32
  }
}

</mosaic_0001>

<bundles_post_ra>
// kernel: tpu_custom_call.1
= control target key start
LH: loop header
LB: loop body
LE: loop exit
PB: predicated region body
PF: predicated region fallthrough
CT: control target
= control target key end

     0   :  { %13 = vsyncpa [#allocation4], 0  ;;  %s3058_s0 = inlined_call_operand.hbm [shape: f32[2,4,16,16], index: 0, kind: input, shape index: {}]   ;;  %s3059_s1 = inlined_call_operand.hbm [shape: f32[2,4,16,16], index: 1, kind: input, shape index: {}]   ;;  %s3060_s2 = inlined_call_operand.hbm [shape: bf16[16,128], index: 2, kind: input, shape index: {}]   ;;  %s3061_s3 = inlined_call_operand.vmem [shape: bf16[16,128], index: 3, kind: input, shape index: {}]   ;;  %s3062_s4 = inlined_call_operand.hbm [shape: bf16[16,128], index: 4, kind: input, shape index: {}]   ;;  %s3063_s5 = inlined_call_operand.hbm [shape: bf16[128,128], index: 5, kind: input, shape index: {}]   ;;  %s3064_s6 = inlined_call_operand.hbm [shape: bf16[128,128], index: 6, kind: input, shape index: {}]   ;;  %s3065_s7 = inlined_call_operand.hbm [shape: bf16[128,128], index: 7, kind: input, shape index: {}]   ;;  %s3066_s8 = inlined_call_operand.hbm [shape: f32[1,1], index: 8, kind: output, shape index: {}]  }
   0x1   :  { %14 = vsyncpa [#allocation7], 0 }
   0x2   :  { %15 = vsyncpa [#allocation10], 0 }
   0x3   :  { %16 = vsyncpa [#allocation13], 0 }
   0x4   :  { %17 = vsyncpa [#allocation5], 0  ;;  %s2235_s27 = smov [#allocation6]   ;;  %s2049_s9 = scalar_lea.hbm %s3059_s1, 2048 }
   0x5   :  { %s35_s28 = sshll.u32 %s2235_s27, 4  ;;  %p2050_p0 = scmp.ne.s32.totalorder %s3059_s1, %s2049_s9  ;;  %s36_s28 = int_to_ptr.vmem [resolvable:$true] %s35_s28 }
   0x6   :  { %p2053_p1 = scmp.lt.u32.totalorder %s2049_s9, %s3059_s1 }
   0x8   :  { %p2055_p2 = pnand %p2053_p1, %p2050_p0 }
   0xa   :  { %2058 = shalt.err (!%p2055_p2)
}
   0xb   :  { %s2059_s14 = scalar_lea.vmem %s36_s28, 2048  ;;  %p2064_p4 = scmp.lt.s32.totalorder %s36_s28, %s36_s28 }
   0xc   :  { %p2060_p3 = scmp.ne.s32.totalorder %s36_s28, %s2059_s14  ;;  %p2065_p5 = scmp.lt.s32.totalorder %s2059_s14, %s2059_s14 }
   0xe   :  { %p2066_p6 = por %p2065_p5, %p2064_p4 }
  0x10   :  { %p2067_p7 = pnand %p2066_p6, %p2060_p3 }
  0x12   :  { %2070 = shalt.err (!%p2067_p7)
}
  0x13   :  { %s2236_s15 = smov 128   ;;  %s2237_s16 = smov 8  }
  0x14   :  { %41 = dma.hbm_to_vmem [thread:$0]  %s3059_s1, 2048, %s36_s28, [#allocation7], %s2236_s15, %s2236_s15, %s2237_s16  }
  0x15   :  { %s2238_s19 = smov [#allocation9]   ;;  %s2239_s21 = smov [#allocation12]  }
  0x16   :  { %s61_s20 = sshll.u32 %s2238_s19, 4  ;;  %s85_s22 = sshll.u32 %s2239_s21, 4  ;;  %s62_s20 = int_to_ptr.vmem [resolvable:$true] %s61_s20  ;;  %s86_s22 = int_to_ptr.vmem [resolvable:$true] %s85_s22 }
  0x17   :  { %s2071_s25 = scalar_lea.hbm %s3062_s4, 128 }
  0x18   :  { %p2072_p8 = scmp.ne.s32.totalorder %s3062_s4, %s2071_s25  ;;  %p2075_p9 = scmp.lt.u32.totalorder %s2071_s25, %s3062_s4 }
  0x1a   :  { %p2077_p10 = pnand %p2075_p9, %p2072_p8 }
  0x1c   :  { %2080 = shalt.err (!%p2077_p10)
}
  0x1d   :  { %s2081_s1 = scalar_lea.vmem %s62_s20, 128  ;;  %p2086_p12 = scmp.lt.s32.totalorder %s62_s20, %s62_s20 }
  0x1e   :  { %p2082_p11 = scmp.ne.s32.totalorder %s62_s20, %s2081_s1  ;;  %p2087_p13 = scmp.lt.s32.totalorder %s2081_s1, %s2081_s1 }
  0x20   :  { %p2088_p0 = por %p2087_p13, %p2086_p12 }
  0x22   :  { %p2089_p1 = pnand %p2088_p0, %p2082_p11 }
  0x24   :  { %2092 = shalt.err (!%p2089_p1)
}
  0x25   :  { %s2240_s28 = smov 64   ;;  %s2241_s9 = smov 4  }
  0x26   :  { %67 = dma.hbm_to_vmem [thread:$0]  %s3062_s4, 128, %s62_s20, [#allocation10], %s2240_s28, %s2240_s28, %s2241_s9  }
  0x27   :  { %s2093_s14 = scalar_lea.hbm %s3064_s6, 1024 }
  0x28   :  { %p2094_p2 = scmp.ne.s32.totalorder %s3064_s6, %s2093_s14  ;;  %p2097_p3 = scmp.lt.u32.totalorder %s2093_s14, %s3064_s6 }
  0x2a   :  { %p2099_p4 = pnand %p2097_p3, %p2094_p2 }
  0x2c   :  { %2102 = shalt.err (!%p2099_p4)
}
  0x2d   :  { %s2103_s23 = scalar_lea.vmem %s86_s22, 1024  ;;  %p2108_p6 = scmp.lt.s32.totalorder %s86_s22, %s86_s22 }
  0x2e   :  { %p2104_p5 = scmp.ne.s32.totalorder %s86_s22, %s2103_s23  ;;  %p2109_p7 = scmp.lt.s32.totalorder %s2103_s23, %s2103_s23 }
  0x30   :  { %p2110_p8 = por %p2109_p7, %p2108_p6 }
  0x32   :  { %p2111_p9 = pnand %p2110_p8, %p2104_p5 }
  0x34   :  { %2114 = shalt.err (!%p2111_p9)
}
  0x35   :  { %91 = dma.hbm_to_vmem [thread:$0]  %s3064_s6, 1024, %s86_s22, [#allocation13], %s2240_s28, %s2240_s28, %s2241_s9  }
  0x36   :  { %s2242_s24 = smov [#allocation3]   ;;  %s2243_s26 = smov [#allocation8]  }
  0x37   :  { %s23_s25 = sshll.u32 %s2242_s24, 4  ;;  %s47_s27 = sshll.u32 %s2243_s26, 4  ;;  %s24_s25 = int_to_ptr.vmem [resolvable:$true] %s23_s25  ;;  %s48_s27 = int_to_ptr.vmem [resolvable:$true] %s47_s27 }
  0x38   :  { %s2115_s1 = scalar_lea.hbm %s3058_s0, 2048 }
  0x39   :  { %p2116_p10 = scmp.ne.s32.totalorder %s3058_s0, %s2115_s1  ;;  %p2119_p11 = scmp.lt.u32.totalorder %s2115_s1, %s3058_s0 }
  0x3b   :  { %p2121_p12 = pnand %p2119_p11, %p2116_p10 }
  0x3d   :  { %2124 = shalt.err (!%p2121_p12)
}
  0x3e   :  { %s2125_s6 = scalar_lea.vmem %s24_s25, 2048  ;;  %p2130_p0 = scmp.lt.s32.totalorder %s24_s25, %s24_s25 }
  0x3f   :  { %p2126_p13 = scmp.ne.s32.totalorder %s24_s25, %s2125_s6  ;;  %p2131_p1 = scmp.lt.s32.totalorder %s2125_s6, %s2125_s6 }
  0x41   :  { %p2132_p2 = por %p2131_p1, %p2130_p0 }
  0x43   :  { %p2133_p3 = pnand %p2132_p2, %p2126_p13 }
  0x45   :  { %2136 = shalt.err (!%p2133_p3)
}
  0x46   :  { %29 = dma.hbm_to_vmem [thread:$0]  %s3058_s0, 2048, %s24_s25, [#allocation4], %s2236_s15, %s2236_s15, %s2237_s16  }
  0x47   :  { %s2137_s19 = scalar_lea.hbm %s3060_s2, 128 }
  0x48   :  { %p2138_p4 = scmp.ne.s32.totalorder %s3060_s2, %s2137_s19  ;;  %p2141_p5 = scmp.lt.u32.totalorder %s2137_s19, %s3060_s2 }
  0x4a   :  { %p2143_p6 = pnand %p2141_p5, %p2138_p4 }
  0x4c   :  { %2146 = shalt.err (!%p2143_p6)
}
  0x4d   :  { %s2147_s24 = scalar_lea.vmem %s48_s27, 128  ;;  %p2152_p8 = scmp.lt.s32.totalorder %s48_s27, %s48_s27 }
  0x4e   :  { %p2148_p7 = scmp.ne.s32.totalorder %s48_s27, %s2147_s24  ;;  %p2153_p9 = scmp.lt.s32.totalorder %s2147_s24, %s2147_s24 }
  0x50   :  { %p2154_p10 = por %p2153_p9, %p2152_p8 }
  0x52   :  { %p2155_p11 = pnand %p2154_p10, %p2148_p7 }
  0x54   :  { %2158 = shalt.err (!%p2155_p11)
}
  0x55   :  { %53 = dma.hbm_to_vmem [thread:$0]  %s3060_s2, 128, %s48_s27, [#allocation7], %s2240_s28, %s2240_s28, %s2241_s9  }
  0x56   :  { %s2244_s16 = smov [#allocation11]   ;;  %s2245_s26 = smov [#allocation14]  }
  0x57   :  { %s73_s25 = sshll.u32 %s2244_s16, 4  ;;  %s97_s29 = sshll.u32 %s2245_s26, 4  ;;  %s74_s25 = int_to_ptr.vmem [resolvable:$true] %s73_s25  ;;  %s98_s29 = int_to_ptr.vmem [resolvable:$true] %s97_s29 }
  0x58   :  { %s2159_s10 = scalar_lea.hbm %s3063_s5, 1024 }
  0x59   :  { %p2160_p12 = scmp.ne.s32.totalorder %s3063_s5, %s2159_s10  ;;  %p2163_p13 = scmp.lt.u32.totalorder %s2159_s10, %s3063_s5 }
  0x5b   :  { %p2165_p0 = pnand %p2163_p13, %p2160_p12 }
  0x5d   :  { %2168 = shalt.err (!%p2165_p0)
}
  0x5e   :  { %s2169_s2 = scalar_lea.vmem %s74_s25, 1024  ;;  %p2174_p2 = scmp.lt.s32.totalorder %s74_s25, %s74_s25 }
  0x5f   :  { %p2170_p1 = scmp.ne.s32.totalorder %s74_s25, %s2169_s2  ;;  %p2175_p3 = scmp.lt.s32.totalorder %s2169_s2, %s2169_s2 }
  0x61   :  { %p2176_p4 = por %p2175_p3, %p2174_p2 }
  0x63   :  { %p2177_p5 = pnand %p2176_p4, %p2170_p1 }
  0x65   :  { %2180 = shalt.err (!%p2177_p5)
}
  0x66   :  { %79 = dma.hbm_to_vmem [thread:$0]  %s3063_s5, 1024, %s74_s25, [#allocation10], %s2240_s28, %s2240_s28, %s2241_s9  }
  0x67   :  { %s2181_s18 = scalar_lea.hbm %s3065_s7, 1024 }
  0x68   :  { %p2182_p6 = scmp.ne.s32.totalorder %s3065_s7, %s2181_s18  ;;  %p2185_p7 = scmp.lt.u32.totalorder %s2181_s18, %s3065_s7 }
  0x6a   :  { %p2187_p8 = pnand %p2185_p7, %p2182_p6 }
  0x6c   :  { %2190 = shalt.err (!%p2187_p8)
}
  0x6d   :  { %s2191_s20 = scalar_lea.vmem %s98_s29, 1024  ;;  %p2196_p10 = scmp.lt.s32.totalorder %s98_s29, %s98_s29 }
  0x6e   :  { %p2192_p9 = scmp.ne.s32.totalorder %s98_s29, %s2191_s20  ;;  %p2197_p11 = scmp.lt.s32.totalorder %s2191_s20, %s2191_s20 }
  0x70   :  { %p2198_p12 = por %p2197_p11, %p2196_p10 }
  0x72   :  { %p2199_p13 = pnand %p2198_p12, %p2192_p9 }
  0x74   :  { %2202 = shalt.err (!%p2199_p13)
}
  0x75   :  { %103 = dma.hbm_to_vmem [thread:$0]  %s3065_s7, 1024, %s98_s29, [#allocation13], %s2240_s28, %s2240_s28, %s2241_s9  }
  0x76   :  { %2225 = dma.done.wait [#allocation4], 2048  }
  0x77   :  { %2226 = vsyncadd [#allocation4], 4294965248 }
  0x78   :  { %2227 = dma.done.wait [#allocation7], 2176  }
  0x79   :  { %2228 = vsyncadd [#allocation7], 4294965120 }
  0x7a   :  { %2229 = dma.done.wait [#allocation10], 1152  }
  0x7b   :  { %2230 = vsyncadd [#allocation10], 4294966144 }
  0x7c   :  { %2231 = dma.done.wait [#allocation13], 2048  }
  0x7d   :  { %2232 = vsyncadd [#allocation13], 4294965248  ;;  %v2246_v0 = vmov 0.0|0.0   ;;  %v1958_v1 = vld [vmem:[#allocation8] sm:$0xff]   ;;  %v133_v4 = vld [vmem:[#allocation3 + $0x8] sm:$0xff]  ;;  %vm271_vm0 = vcmask 130048  }
  0x7e   :  { %1814 = vmatprep.mubr.bf16.mxu1 %v2246_v0  ;;  %v1959_v2 = vld [vmem:[%s3061_s3] sm:$0xff]   ;;  %1794 = vmatprep.subr.bf16.mxu0 %v1958_v1  ;;  %v134_v5 = vld [vmem:[#allocation3 + $0x10] sm:$0xff]  ;;  %v137_v8 = vld [vmem:[#allocation3 + $0x28] sm:$0xff]  ;;  %vm130_vm1 = vcmask 0   ;;  %s2248_s3 = smov [#allocation15]  }
  0x7f   :  { %v132_v3 = vld [vmem:[#allocation3] sm:$0xff]  ;;  %1812 = vmatprep.subr.bf16.mxu1 %v1959_v2  ;;  %1795 = vmatpush3.bf16.msra.mxu0 %v1958_v1  ;;  %v135_v6 = vld [vmem:[#allocation3 + $0x18] sm:$0xff]  ;;  %v138_v9 = vld [vmem:[#allocation3 + $0x30] sm:$0xff]  ;;  %s1660_s7 = sshll.u32 %s2248_s3, 4  ;;  %s1661_s7 = int_to_ptr.vmem [resolvable:$true] %s1660_s7 }
  0x80   :  { %v136_v7 = vld [vmem:[#allocation3 + $0x20] sm:$0xff]  ;;  %1813 = vmatpush3.bf16.msra.mxu1 %v1959_v2  ;;  %v139_v10 = vld [vmem:[#allocation3 + $0x38] sm:$0xff]  ;;  %v149_v12 = vld [vmem:[#allocation6 + $0x8] sm:$0xff]  ;;  %s2203_s28 = scalar_lea.vmem %s1661_s7, 16  ;;  %s2207_s9 = scalar_lea.vmem %s1661_s7, 32 }
  0x81   :  { %v148_v11 = vld [vmem:[#allocation6] sm:$0xff]  ;;  %v150_v13 = vld [vmem:[#allocation6 + $0x10] sm:$0xff]  ;;  %v151_v14 = vld [vmem:[#allocation6 + $0x18] sm:$0xff]  ;;  %v165_v19 = vsub.f32 %v133_v4, %v149_v12  ;;  %p2204_p0 = scmp.ne.s32.totalorder %s1661_s7, %s2203_s28  ;;  %p2208_p1 = scmp.lt.s32.totalorder %s1661_s7, %s1661_s7 }
  0x82   :  { %v164_v15 = vsub.f32 %v132_v3, %v148_v11  ;;  %v152_v16 = vld [vmem:[#allocation6 + $0x20] sm:$0xff]  ;;  %v153_v17 = vld [vmem:[#allocation6 + $0x28] sm:$0xff]  ;;  %v154_v18 = vld [vmem:[#allocation6 + $0x30] sm:$0xff]  ;;  %v166_v20 = vsub.f32 %v134_v5, %v150_v13  ;;  %v167_v21 = vsub.f32 %v135_v6, %v151_v14  ;;  %p2209_p2 = scmp.lt.s32.totalorder %s2207_s9, %s2203_s28 }
  0x83   :  { %v155_v22 = vld [vmem:[#allocation6 + $0x38] sm:$0xff]  ;;  %v168_v23 = vsub.f32 %v136_v7, %v152_v16  ;;  %v169_v24 = vsub.f32 %v137_v8, %v153_v17  ;;  %v170_v25 = vsub.f32 %v138_v9, %v154_v18  ;;  %v1960_v30 = vld [vmem:[#allocation9] sm:$0xff]   ;;  %v140_v39 = vld [vmem:[#allocation3 + $0x40] sm:$0xff] }
  0x84   :  { %v171_v26 = vsub.f32 %v139_v10, %v155_v22  ;;  %v180_v27 = vadd.f32 %v166_v20, %v164_v15  ;;  %v181_v28 = vadd.f32 %v167_v21, %v165_v19  ;;  %v190_v29 = vmul.f32 -1.0, %v166_v20  ;;  %1830 = vmatprep.subr.bf16.mxu0 %v1960_v30  ;;  %v141_v40 = vld [vmem:[#allocation3 + $0x48] sm:$0xff]  ;;  %v142_v45 = vld [vmem:[#allocation3 + $0x50] sm:$0xff]  ;;  %v143_v46 = vld [vmem:[#allocation3 + $0x58] sm:$0xff]  ;;  %p2210_p3 = por %p2209_p2, %p2208_p1 }
  0x85   :  { %v186_v31 = vmul.f32 -1.0, %v168_v23  ;;  %v187_v32 = vmul.f32 -1.0, %v169_v24  ;;  %v191_v33 = vmul.f32 -1.0, %v167_v21  ;;  %v198_v34 = vmul.f32 -1.0, %v170_v25  ;;  %v156_v47 = vld [vmem:[#allocation6 + $0x40] sm:$0xff]  ;;  %v157_v48 = vld [vmem:[#allocation6 + $0x48] sm:$0xff] }
  0x86   :  { %v182_v35 = vadd.f32 %v180_v27, %v168_v23  ;;  %v183_v36 = vadd.f32 %v181_v28, %v169_v24  ;;  %v2403_v37 = vadd.f32 %v190_v29, %v170_v25  ;;  %v194_v38 = vadd.f32 %v190_v29, %v164_v15  ;;  %v144_v53 = vld [vmem:[#allocation3 + $0x60] sm:$0xff]  ;;  %v145_v54 = vld [vmem:[#allocation3 + $0x68] sm:$0xff]  ;;  %v146_v55 = vld [vmem:[#allocation3 + $0x70] sm:$0xff]  ;;  %p2211_p4 = pnand %p2210_p3, %p2204_p0 }
  0x87   :  { %v2405_v41 = vadd.f32 %v186_v31, %v164_v15  ;;  %v2407_v42 = vadd.f32 %v187_v32, %v165_v19  ;;  %v2409_v43 = vadd.f32 %v191_v33, %v171_v26  ;;  %v195_v44 = vadd.f32 %v191_v33, %v165_v19  ;;  %v158_v56 = vld [vmem:[#allocation6 + $0x50] sm:$0xff]  ;;  %v159_v57 = vld [vmem:[#allocation6 + $0x58] sm:$0xff]  ;;  %v160_v58 = vld [vmem:[#allocation6 + $0x60] sm:$0xff] }
  0x88   :  { %v184_v49 = vadd.f32 %v182_v35, %v170_v25  ;;  %v185_v50 = vadd.f32 %v183_v36, %v171_v26  ;;  %v196_v51 = vadd.f32 %v194_v38, %v168_v23  ;;  %v199_v52 = vmul.f32 -1.0, %v171_v26  ;;  %v147_v61 = vld [vmem:[#allocation3 + $0x78] sm:$0xff]  ;;  %v161_v62 = vld [vmem:[#allocation6 + $0x68] sm:$0xff]  ;;  %v162_v63 = vld [vmem:[#allocation6 + $0x70] sm:$0xff] }
  0x89   :  { %v229_v59 = vpack.c.bf16 %v2407_v42, %v2405_v41  ;;  %v235_v60 = vpack.c.bf16 %v2409_v43, %v2403_v37  ;;  %v163_v1 = vld [vmem:[#allocation6 + $0x78] sm:$0xff]  ;;  %v197_v3 = vadd.f32 %v195_v44, %v169_v24  ;;  %v2417_v5 = vadd.f32 %v198_v34, %v166_v20 }
  0x8a   :  { %v2415_v2 = vpack.c.bf16 %v185_v50, %v184_v49  ;;  %v200_v4 = vadd.f32 %v198_v34, %v196_v51  ;;  %v203_v6 = vadd.f32 %v199_v52, %v167_v21  ;;  %v172_v7 = vsub.f32 %v140_v39, %v156_v47 }
  0x8b   :  { %1815 = vmatmul.mubr.msk.bf16.vlgmr.msra.gmra.mrb[0].mxu1 %vm271_vm0, %v235_v60  ;;  %v173_v8 = vsub.f32 %v141_v40, %v157_v48  ;;  %v201_v9 = vadd.f32 %v199_v52, %v197_v3  ;;  %v174_v10 = vsub.f32 %v142_v45, %v158_v56  ;;  %v175_v11 = vsub.f32 %v143_v46, %v159_v57 }
  0x8c   :  { %1796 = vmatprep.mubr.msk.bf16.mxu0 %vm271_vm0, %v2415_v2  ;;  %1818 = vmatprep.mubr.bf16.mxu1 %v2246_v0  ;;  %v236_v12 = vpack.c.bf16 %v203_v6, %v2417_v5  ;;  %v176_v13 = vsub.f32 %v144_v53, %v160_v58  ;;  %v177_v14 = vsub.f32 %v145_v54, %v161_v62 }
  0x8d   :  { %1797 = vmatmul.mubr.msk.bf16.vlgmr.msra.gmra.mrb[0].mxu0 %vm271_vm0, %v229_v59  ;;  %v178_v15 = vsub.f32 %v146_v55, %v162_v63  ;;  %v230_v16 = vpack.c.bf16 %v201_v9, %v200_v4  ;;  %v179_v17 = vsub.f32 %v147_v61, %v163_v1  ;;  %v204_v18 = vadd.f32 %v174_v10, %v172_v7 }
  0x8e   :  { %1831 = vmatpush3.bf16.msra.mxu0 %v1960_v30  ;;  %v205_v19 = vadd.f32 %v175_v11, %v173_v8  ;;  %v210_v20 = vmul.f32 -1.0, %v176_v13  ;;  %v211_v21 = vmul.f32 -1.0, %v177_v14  ;;  %v214_v22 = vmul.f32 -1.0, %v174_v10 }
  0x8f   :  { %v215_v23 = vmul.f32 -1.0, %v175_v11  ;;  %1800 = vmatprep.mubr.msk.bf16.mxu0 %vm271_vm0, %v230_v16  ;;  %v206_v24 = vadd.f32 %v204_v18, %v176_v13  ;;  %v222_v26 = vmul.f32 -1.0, %v178_v15  ;;  %v223_v27 = vmul.f32 -1.0, %v179_v17 }
  0x90   :  { %v207_v25 = vadd.f32 %v205_v19, %v177_v14  ;;  %v218_v31 = vadd.f32 %v214_v22, %v172_v7  ;;  %v216_v30 = vadd.f32 %v214_v22, %v178_v15  ;;  %v212_v38 = vadd.f32 %v210_v20, %v172_v7 }
  0x91   :  { %v208_v28 = vadd.f32 %v206_v24, %v178_v15  ;;  %v219_v32 = vadd.f32 %v215_v23, %v173_v8  ;;  %v217_v33 = vadd.f32 %v215_v23, %v179_v17  ;;  %v213_v39 = vadd.f32 %v211_v21, %v173_v8 }
  0x92   :  { %v209_v29 = vadd.f32 %v207_v25, %v179_v17  ;;  %v220_v35 = vadd.f32 %v218_v31, %v176_v13  ;;  %v226_v48 = vadd.f32 %v222_v26, %v174_v10  ;;  %v227_v49 = vadd.f32 %v223_v27, %v175_v11 }
  0x93   :  { %1819 = vmatmul.mubr.msk.bf16.gmra.mrb[4].mxu1 %vm271_vm0, %v236_v12  ;;  %v221_v36 = vadd.f32 %v219_v32, %v177_v14  ;;  %v237_v45 = vpack.c.bf16 %v217_v33, %v216_v30  ;;  %v232_v46 = vpack.c.bf16 %v213_v39, %v212_v38  ;;  %v241_v51 = vadd.f32 %v2403_v37, %v2405_v41 }
  0x94   :  { %v231_v34 = vpack.c.bf16 %v209_v29, %v208_v28  ;;  %1822 = vmatprep.mubr.bf16.mxu1 %v2246_v0  ;;  %v224_v40 = vadd.f32 %v222_v26, %v220_v35  ;;  %v238_v50 = vpack.c.bf16 %v227_v49, %v226_v48  ;;  %v242_v52 = vadd.f32 %v2409_v43, %v2407_v42 }
  0x95   :  { %1801 = vmatmul.mubr.msk.bf16.gmra.mrb[4].mxu0 %vm271_vm0, %v229_v59  ;;  %v225_v44 = vadd.f32 %v223_v27, %v221_v36  ;;  %v246_v54 = vadd.f32 %v203_v6, %v2407_v42  ;;  %v249_v37 = vadd.f32 %v216_v30, %v212_v38  ;;  %v250_v43 = vadd.f32 %v217_v33, %v213_v39  ;;  %v1969_v42 = vld [vmem:[#allocation12] sm:$0xff]  }
  0x96   :  { %1804 = vmatprep.mubr.msk.bf16.mxu0 %vm271_vm0, %v231_v34  ;;  %v256_v53 = vpack.c.bf16 %v242_v52, %v241_v51  ;;  %v253_v57 = vadd.f32 %v226_v48, %v212_v38  ;;  %v254_v58 = vadd.f32 %v227_v49, %v213_v39 }
  0x97   :  { %v233_v47 = vpack.c.bf16 %v225_v44, %v224_v40  ;;  %v260_v56 = vpack.c.bf16 %v250_v43, %v249_v37 }
  0x98   :  { %v262_v59 = vpack.c.bf16 %v254_v58, %v253_v57 }
  0x9b   :  { %1823 = vmatmul.mubr.msk.bf16.gmra.mrb[8].mxu1 %vm271_vm0, %v237_v45 }
  0x9c   :  { %1826 = vmatprep.mubr.bf16.mxu1 %v2246_v0  ;;  %v245_v0 = vadd.f32 %v2417_v5, %v2405_v41  ;;  %v1961_v41 = vld [vmem:[#allocation11] sm:$0xff]  }
  0x9d   :  { %1805 = vmatmul.mubr.msk.bf16.gmra.mrb[8].mxu0 %vm271_vm0, %v232_v46 }
  0x9e   :  { %1808 = vmatprep.mubr.msk.bf16.mxu0 %vm271_vm0, %v233_v47  ;;  %v258_v55 = vpack.c.bf16 %v246_v54, %v245_v0 }
  0xa3   :  { %1827 = vmatmul.mubr.msk.bf16.gmra.mrb[12].mxu1 %vm271_vm0, %v238_v50 }
  0xa4   :  { %1864 = vmatprep.mubr.bf16.mxu1 %v1961_v41 }
  0xa5   :  { %1809 = vmatmul.mubr.msk.bf16.gmra.mrb[12].mxu0 %vm271_vm0, %v232_v46 }
  0xa6   :  { %1832 = vmatprep.mubr.msk.bf16.mxu0 %vm271_vm0, %v2415_v2 }
  0xad   :  { %1833 = vmatmul.mubr.msk.bf16.vlgmr.msra.gmra.mrb[16].mxu0 %vm271_vm0, %v256_v53 }
  0xae   :  { %1836 = vmatprep.mubr.msk.bf16.mxu0 %vm271_vm0, %v230_v16 }
  0xb5   :  { %1837 = vmatmul.mubr.msk.bf16.gmra.mrb[20].mxu0 %vm271_vm0, %v258_v55 }
  0xb6   :  { %1840 = vmatprep.mubr.msk.bf16.mxu0 %vm271_vm0, %v231_v34 }
  0xbd   :  { %1841 = vmatmul.mubr.msk.bf16.gmra.mrb[24].mxu0 %vm271_vm0, %v260_v56 }
  0xbe   :  { %1844 = vmatprep.mubr.msk.bf16.mxu0 %vm271_vm0, %v233_v47 }
  0xc5   :  { %1845 = vmatmul.mubr.msk.bf16.gmra.mrb[28].mxu0 %vm271_vm0, %v262_v59 }
  0xc6   :  { %1896 = vmatprep.mubr.bf16.mxu0 %v1969_v42 }
 0x15e   :  { %v2452_v60 = vpop.f32.mrb[0].mxu1 }
 0x15f   :  { %v2454_v61 = vpop.f32.mrb[1].mxu1 }
 0x160   :  { %v2456_v62 = vpop.f32.mrb[0].mxu0  ;;  %v2458_v63 = vpop.f32.mrb[2].mxu1 }
 0x161   :  { %v2462_v1 = vsub.f32 %v2456_v62, %v2452_v60  ;;  %v2464_v2 = vpop.f32.mrb[1].mxu0  ;;  %v2466_v3 = vpop.f32.mrb[3].mxu1 }
 0x162   :  { %v2470_v4 = vsub.f32 %v2464_v2, %v2454_v61  ;;  %v2472_v5 = vpop.f32.mrb[2].mxu0 }
 0x163   :  { %v2476_v6 = vsub.f32 %v2472_v5, %v2458_v63  ;;  %v2478_v7 = vpop.f32.mrb[3].mxu0 }
 0x164   :  { %v2482_v8 = vsub.f32 %v2478_v7, %v2466_v3 }
 0x165   :  { %v685_v9 = vpack.c.bf16 %v2476_v6, %v2462_v1 }
 0x166   :  { %v684_v10 = vpack.c.bf16 %v2482_v8, %v2470_v4  ;;  %v2488_v11 = vpop.f32.mrb[4].mxu1 }
 0x167   :  { %v2490_v12 = vpop.f32.mrb[5].mxu1 }
 0x168   :  { %v2492_v13 = vpop.f32.mrb[4].mxu0  ;;  %1848 = vmatprep.subr.bf16.mxu1 %v684_v10  ;;  %v2494_v14 = vpop.f32.mrb[6].mxu1 }
 0x169   :  { %v2498_v15 = vsub.f32 %v2492_v13, %v2488_v11  ;;  %v2500_v16 = vpop.f32.mrb[5].mxu0  ;;  %1849 = vmatpush3.bf16.msra.mxu1 %v684_v10  ;;  %v2502_v17 = vpop.f32.mrb[7].mxu1 }
 0x16a   :  { %v2506_v18 = vsub.f32 %v2500_v16, %v2490_v12  ;;  %v2508_v19 = vpop.f32.mrb[6].mxu0  ;;  %1850 = vmatprep.subr.bf16.mxu1 %v685_v9 }
 0x16b   :  { %v2512_v20 = vsub.f32 %v2508_v19, %v2494_v14  ;;  %v2514_v21 = vpop.f32.mrb[7].mxu0 }
 0x16c   :  { %v2518_v22 = vsub.f32 %v2514_v21, %v2502_v17 }
 0x16d   :  { %v687_v23 = vpack.c.bf16 %v2512_v20, %v2498_v15  ;;  %1851 = vmatpush3.bf16.msra.mxu1 %v685_v9 }
 0x16e   :  { %v686_v24 = vpack.c.bf16 %v2518_v22, %v2506_v18  ;;  %v2524_v25 = vpop.f32.mrb[8].mxu1 }
 0x16f   :  { %v2526_v26 = vpop.f32.mrb[9].mxu1 }
 0x170   :  { %v2528_v27 = vpop.f32.mrb[8].mxu0  ;;  %1852 = vmatprep.subr.bf16.mxu1 %v686_v24  ;;  %v2530_v28 = vpop.f32.mrb[10].mxu1 }
 0x171   :  { %v2534_v29 = vsub.f32 %v2528_v27, %v2524_v25  ;;  %v2536_v31 = vpop.f32.mrb[9].mxu0  ;;  %1853 = vmatpush3.bf16.msra.mxu1 %v686_v24  ;;  %v2538_v32 = vpop.f32.mrb[11].mxu1 }
 0x172   :  { %v2542_v30 = vsub.f32 %v2536_v31, %v2526_v26  ;;  %v2544_v33 = vpop.f32.mrb[10].mxu0  ;;  %1854 = vmatprep.subr.bf16.mxu1 %v687_v23 }
 0x173   :  { %v2548_v34 = vsub.f32 %v2544_v33, %v2530_v28  ;;  %v2550_v35 = vpop.f32.mrb[11].mxu0 }
 0x174   :  { %v2554_v36 = vsub.f32 %v2550_v35, %v2538_v32 }
 0x175   :  { %v689_v38 = vpack.c.bf16 %v2548_v34, %v2534_v29  ;;  %1855 = vmatpush3.bf16.msra.mxu1 %v687_v23  ;;  %v1962_v23 = vld [vmem:[#allocation11 + $0x8] sm:$0xff]  }
 0x176   :  { %v688_v39 = vpack.c.bf16 %v2554_v36, %v2542_v30  ;;  %v2560_v40 = vpop.f32.mrb[12].mxu1 }
 0x177   :  { %v2562_v44 = vpop.f32.mrb[13].mxu1 }
 0x178   :  { %v2564_v45 = vpop.f32.mrb[12].mxu0  ;;  %1856 = vmatprep.subr.bf16.mxu1 %v688_v39  ;;  %v2566_v46 = vpop.f32.mrb[14].mxu1 }
 0x179   :  { %v2570_v47 = vsub.f32 %v2564_v45, %v2560_v40  ;;  %v2572_v48 = vpop.f32.mrb[13].mxu0  ;;  %1857 = vmatpush3.bf16.msra.mxu1 %v688_v39  ;;  %v2574_v49 = vpop.f32.mrb[15].mxu1 }
 0x17a   :  { %v2578_v50 = vsub.f32 %v2572_v48, %v2562_v44  ;;  %v2580_v51 = vpop.f32.mrb[14].mxu0  ;;  %1858 = vmatprep.subr.bf16.mxu1 %v689_v38 }
 0x17b   :  { %v2584_v52 = vsub.f32 %v2580_v51, %v2566_v46  ;;  %v2586_v53 = vpop.f32.mrb[15].mxu0 }
 0x17c   :  { %v2590_v0 = vsub.f32 %v2586_v53, %v2574_v49 }
 0x17d   :  { %v691_v54 = vpack.c.bf16 %v2584_v52, %v2570_v47  ;;  %1859 = vmatpush3.bf16.msra.mxu1 %v689_v38  ;;  %v1963_v38 = vld [vmem:[#allocation11 + $0x10] sm:$0xff]  }
 0x17e   :  { %v690_v55 = vpack.c.bf16 %v2590_v0, %v2578_v50 }
 0x180   :  { %v1834_v37 = vpop.f32.mrb[16].mxu0  ;;  %1860 = vmatprep.subr.bf16.mxu1 %v690_v55 }
 0x181   :  { %v654_v43 = vsub.f32 %v1834_v37, %v2456_v62  ;;  %v573_v56 = vpop.f32.mrb[17].mxu0  ;;  %1861 = vmatpush3.bf16.msra.mxu1 %v690_v55 }
 0x182   :  { %v652_v57 = vsub.f32 %v573_v56, %v2464_v2  ;;  %v1835_v58 = vpop.f32.mrb[18].mxu0  ;;  %1862 = vmatprep.subr.bf16.mxu1 %v691_v54 }
 0x183   :  { %v670_v59 = vsub.f32 %v654_v43, %v2452_v60  ;;  %v655_v41 = vsub.f32 %v1835_v58, %v2472_v5  ;;  %v576_v42 = vpop.f32.mrb[19].mxu0 }
 0x184   :  { %v668_v9 = vsub.f32 %v652_v57, %v2454_v61  ;;  %v653_v10 = vsub.f32 %v576_v42, %v2478_v7 }
 0x185   :  { %v702_v24 = vadd.f32 %v670_v59, %v2462_v1  ;;  %v671_v62 = vsub.f32 %v655_v41, %v2458_v63  ;;  %1863 = vmatpush3.bf16.msra.mxu1 %v691_v54 }
 0x186   :  { %v700_v2 = vadd.f32 %v668_v9, %v2470_v4  ;;  %v669_v39 = vsub.f32 %v653_v10, %v2466_v3 }
 0x187   :  { %v703_v60 = vadd.f32 %v671_v62, %v2476_v6  ;;  %v693_v55 = vpack.c.bf16 %v671_v62, %v670_v59  ;;  %v1965_v59 = vld [vmem:[#allocation11 + $0x20] sm:$0xff]  }
 0x188   :  { %v701_v5 = vadd.f32 %v669_v39, %v2482_v8  ;;  %v1838_v37 = vpop.f32.mrb[20].mxu0  ;;  %1865 = vmatmul.mubr.bf16.vlgmr.msra.gmra.mrb[16].mxu1 %v1962_v23  ;;  %v692_v61 = vpack.c.bf16 %v669_v39, %v668_v9  ;;  %v1967_v39 = vld [vmem:[#allocation11 + $0x30] sm:$0xff]  }
 0x189   :  { %v658_v7 = vsub.f32 %v1838_v37, %v2492_v13  ;;  %v589_v43 = vpop.f32.mrb[21].mxu0  ;;  %v717_v1 = vpack.c.bf16 %v703_v60, %v702_v24  ;;  %1868 = vmatprep.mubr.bf16.mxu1 %v1963_v38  ;;  %v1964_v13 = vld [vmem:[#allocation11 + $0x18] sm:$0xff]  }
 0x18a   :  { %v656_v63 = vsub.f32 %v589_v43, %v2500_v16  ;;  %v1839_v54 = vpop.f32.mrb[22].mxu0  ;;  %1880 = vmatprep.subr.bf16.mxu0 %v692_v61  ;;  %v716_v4 = vpack.c.bf16 %v701_v5, %v700_v2 }
 0x18b   :  { %v674_v3 = vsub.f32 %v658_v7, %v2488_v11  ;;  %v659_v6 = vsub.f32 %v1839_v54, %v2508_v19  ;;  %v592_v56 = vpop.f32.mrb[23].mxu0  ;;  %1881 = vmatpush3.bf16.msra.mxu0 %v692_v61  ;;  %v1971_v54 = vld [vmem:[#allocation14] sm:$0xff]  }
 0x18c   :  { %v672_v8 = vsub.f32 %v656_v63, %v2490_v12  ;;  %v657_v57 = vsub.f32 %v592_v56, %v2514_v21  ;;  %1882 = vmatprep.subr.bf16.mxu0 %v693_v55  ;;  %1912 = vmatprep.subr.bf16.mxu1 %v716_v4  ;;  %v1977_v56 = vld [vmem:[#allocation12 + $0x20] sm:$0xff]  }
 0x18d   :  { %v706_v58 = vadd.f32 %v674_v3, %v2498_v15  ;;  %v675_v16 = vsub.f32 %v659_v6, %v2494_v14  ;;  %1913 = vmatpush3.bf16.msra.mxu1 %v716_v4 }
 0x18e   :  { %v704_v41 = vadd.f32 %v672_v8, %v2506_v18  ;;  %v673_v11 = vsub.f32 %v657_v57, %v2502_v17  ;;  %1914 = vmatprep.subr.bf16.mxu1 %v717_v1  ;;  %v1979_v57 = vld [vmem:[#allocation14 + $0x20] sm:$0xff]  }
 0x18f   :  { %v707_v19 = vadd.f32 %v675_v16, %v2512_v20  ;;  %1883 = vmatpush3.bf16.msra.mxu0 %v693_v55  ;;  %v695_v12 = vpack.c.bf16 %v675_v16, %v674_v3  ;;  %v1980_v16 = vld [vmem:[#allocation14 + $0x28] sm:$0xff]  }
 0x190   :  { %v705_v21 = vadd.f32 %v673_v11, %v2518_v22  ;;  %v1842_v42 = vpop.f32.mrb[24].mxu0  ;;  %1869 = vmatmul.mubr.bf16.gmra.mrb[20].mxu1 %v1964_v13  ;;  %v694_v9 = vpack.c.bf16 %v673_v11, %v672_v8  ;;  %v1976_v8 = vld [vmem:[#allocation14 + $0x18] sm:$0xff]   ;;  %v1978_v13 = vld [vmem:[#allocation12 + $0x28] sm:$0xff]  }
 0x191   :  { %v662_v15 = vsub.f32 %v1842_v42, %v2528_v27  ;;  %v605_v10 = vpop.f32.mrb[25].mxu0  ;;  %1915 = vmatpush3.bf16.msra.mxu1 %v717_v1  ;;  %v719_v14 = vpack.c.bf16 %v707_v19, %v706_v58  ;;  %1872 = vmatprep.mubr.bf16.mxu1 %v1965_v59  ;;  %v1966_v27 = vld [vmem:[#allocation11 + $0x28] sm:$0xff]   ;;  %v1981_v58 = vld [vmem:[#allocation12 + $0x30] sm:$0xff]   ;;  %v1984_v11 = vld [vmem:[#allocation14 + $0x38] sm:$0xff]  }
 0x192   :  { %v660_v18 = vsub.f32 %v605_v10, %v2536_v31  ;;  %v1843_v23 = vpop.f32.mrb[26].mxu0  ;;  %1884 = vmatprep.subr.bf16.mxu0 %v694_v9  ;;  %v718_v17 = vpack.c.bf16 %v705_v21, %v704_v41  ;;  %v1983_v59 = vld [vmem:[#allocation14 + $0x30] sm:$0xff]   ;;  %v1982_v41 = vld [vmem:[#allocation12 + $0x38] sm:$0xff]  }
 0x193   :  { %v678_v20 = vsub.f32 %v662_v15, %v2524_v25  ;;  %v663_v24 = vsub.f32 %v1843_v23, %v2544_v33  ;;  %v608_v62 = vpop.f32.mrb[27].mxu0  ;;  %1885 = vmatpush3.bf16.msra.mxu0 %v694_v9 }
 0x194   :  { %v676_v22 = vsub.f32 %v660_v18, %v2526_v26  ;;  %v661_v38 = vsub.f32 %v608_v62, %v2550_v35  ;;  %1886 = vmatprep.subr.bf16.mxu0 %v695_v12  ;;  %1916 = vmatprep.subr.bf16.mxu1 %v718_v17 }
 0x195   :  { %v710_v2 = vadd.f32 %v678_v20, %v2534_v29  ;;  %v679_v31 = vsub.f32 %v663_v24, %v2530_v28  ;;  %1917 = vmatpush3.bf16.msra.mxu1 %v718_v17 }
 0x196   :  { %v708_v60 = vadd.f32 %v676_v22, %v2542_v30  ;;  %v677_v25 = vsub.f32 %v661_v38, %v2538_v32  ;;  %1918 = vmatprep.subr.bf16.mxu1 %v719_v14 }
 0x197   :  { %v711_v33 = vadd.f32 %v679_v31, %v2548_v34  ;;  %1887 = vmatpush3.bf16.msra.mxu0 %v695_v12  ;;  %v697_v26 = vpack.c.bf16 %v679_v31, %v678_v20 }
 0x198   :  { %v709_v35 = vadd.f32 %v677_v25, %v2554_v36  ;;  %v1846_v55 = vpop.f32.mrb[28].mxu0  ;;  %1873 = vmatmul.mubr.bf16.gmra.mrb[24].mxu1 %v1966_v27  ;;  %v696_v5 = vpack.c.bf16 %v677_v25, %v676_v22 }
 0x199   :  { %v666_v29 = vsub.f32 %v1846_v55, %v2564_v45  ;;  %v621_v37 = vpop.f32.mrb[29].mxu0  ;;  %1919 = vmatpush3.bf16.msra.mxu1 %v719_v14  ;;  %v721_v28 = vpack.c.bf16 %v711_v33, %v710_v2  ;;  %1876 = vmatprep.mubr.bf16.mxu1 %v1967_v39  ;;  %v1968_v45 = vld [vmem:[#allocation11 + $0x38] sm:$0xff]  }
 0x19a   :  { %v664_v30 = vsub.f32 %v621_v37, %v2572_v48  ;;  %v1847_v61 = vpop.f32.mrb[30].mxu0  ;;  %1888 = vmatprep.subr.bf16.mxu0 %v696_v5  ;;  %v720_v32 = vpack.c.bf16 %v709_v35, %v708_v60 }
 0x19b   :  { %v682_v34 = vsub.f32 %v666_v29, %v2560_v40  ;;  %v667_v7 = vsub.f32 %v1847_v61, %v2580_v51  ;;  %v624_v43 = vpop.f32.mrb[31].mxu0  ;;  %1889 = vmatpush3.bf16.msra.mxu0 %v696_v5 }
 0x19c   :  { %v680_v36 = vsub.f32 %v664_v30, %v2562_v44  ;;  %v665_v1 = vsub.f32 %v624_v43, %v2586_v53  ;;  %1890 = vmatprep.subr.bf16.mxu0 %v697_v26  ;;  %1920 = vmatprep.subr.bf16.mxu1 %v720_v32 }
 0x19d   :  { %v714_v63 = vadd.f32 %v682_v34, %v2570_v47  ;;  %v683_v48 = vsub.f32 %v667_v7, %v2566_v46  ;;  %1921 = vmatpush3.bf16.msra.mxu1 %v720_v32  ;;  %v1970_v47 = vld [vmem:[#allocation12 + $0x8] sm:$0xff]  }
 0x19e   :  { %v712_v4 = vadd.f32 %v680_v36, %v2578_v50  ;;  %v681_v40 = vsub.f32 %v665_v1, %v2574_v49  ;;  %1922 = vmatprep.subr.bf16.mxu1 %v721_v28  ;;  %v1973_v49 = vld [vmem:[#allocation12 + $0x10] sm:$0xff]   ;;  %v1972_v50 = vld [vmem:[#allocation14 + $0x8] sm:$0xff]  }
 0x19f   :  { %v715_v51 = vadd.f32 %v683_v48, %v2584_v52  ;;  %1891 = vmatpush3.bf16.msra.mxu0 %v697_v26  ;;  %v699_v44 = vpack.c.bf16 %v683_v48, %v682_v34  ;;  %v1975_v52 = vld [vmem:[#allocation14 + $0x10] sm:$0xff]  }
 0x1a0   :  { %v713_v53 = vadd.f32 %v681_v40, %v2590_v0  ;;  %1877 = vmatmul.mubr.bf16.gmra.mrb[28].mxu1 %v1968_v45  ;;  %v698_v3 = vpack.c.bf16 %v681_v40, %v680_v36  ;;  %v1974_v0 = vld [vmem:[#allocation12 + $0x18] sm:$0xff]  }
 0x1a1   :  { %1923 = vmatpush3.bf16.msra.mxu1 %v721_v28  ;;  %v723_v6 = vpack.c.bf16 %v715_v51, %v714_v63  ;;  %1928 = vmatprep.mubr.bf16.mxu1 %v1971_v54 }
 0x1a2   :  { %1892 = vmatprep.subr.bf16.mxu0 %v698_v3  ;;  %v722_v46 = vpack.c.bf16 %v713_v53, %v712_v4 }
 0x1a3   :  { %1893 = vmatpush3.bf16.msra.mxu0 %v698_v3 }
 0x1a4   :  { %1894 = vmatprep.subr.bf16.mxu0 %v699_v44  ;;  %1924 = vmatprep.subr.bf16.mxu1 %v722_v46 }
 0x1a5   :  { %1925 = vmatpush3.bf16.msra.mxu1 %v722_v46 }
 0x1a6   :  { %1926 = vmatprep.subr.bf16.mxu1 %v723_v6 }
 0x1a7   :  { %1895 = vmatpush3.bf16.msra.mxu0 %v699_v44 }
 0x1a9   :  { %1927 = vmatpush3.bf16.msra.mxu1 %v723_v6 }
 0x1aa   :  { %1897 = vmatmul.mubr.bf16.vlgmr.msra.gmra.mrb[32].mxu0 %v1970_v47 }
 0x1ab   :  { %1900 = vmatprep.mubr.bf16.mxu0 %v1973_v49 }
 0x1ac   :  { %1929 = vmatmul.mubr.bf16.vlgmr.msra.gmra.mrb[32].mxu1 %v1972_v50 }
 0x1ad   :  { %1932 = vmatprep.mubr.bf16.mxu1 %v1975_v52 }
 0x1b2   :  { %1901 = vmatmul.mubr.bf16.gmra.mrb[36].mxu0 %v1974_v0 }
 0x1b3   :  { %1904 = vmatprep.mubr.bf16.mxu0 %v1977_v56 }
 0x1b4   :  { %1933 = vmatmul.mubr.bf16.gmra.mrb[36].mxu1 %v1976_v8 }
 0x1b5   :  { %1936 = vmatprep.mubr.bf16.mxu1 %v1979_v57 }
 0x1ba   :  { %1905 = vmatmul.mubr.bf16.gmra.mrb[40].mxu0 %v1978_v13 }
 0x1bb   :  { %1908 = vmatprep.mubr.bf16.mxu0 %v1981_v58 }
 0x1bc   :  { %1937 = vmatmul.mubr.bf16.gmra.mrb[40].mxu1 %v1980_v16 }
 0x1bd   :  { %1940 = vmatprep.mubr.bf16.mxu1 %v1983_v59 }
 0x1c2   :  { %1909 = vmatmul.mubr.bf16.gmra.mrb[44].mxu0 %v1982_v41 }
 0x1c4   :  { %1941 = vmatmul.mubr.bf16.gmra.mrb[44].mxu1 %v1984_v11 }
 0x25b   :  { %v1866_v19 = vpop.f32.mrb[16].mxu1 }
 0x25c   :  { %v822_v12 = vpop.f32.mrb[17].mxu1 }
 0x25d   :  { %v1867_v21 = vpop.f32.mrb[18].mxu1 }
 0x25e   :  { %v825_v42 = vpop.f32.mrb[19].mxu1 }
 0x263   :  { %v1870_v9 = vpop.f32.mrb[20].mxu1 }
 0x264   :  { %v838_v15 = vpop.f32.mrb[21].mxu1 }
 0x265   :  { %v1871_v10 = vpop.f32.mrb[22].mxu1 }
 0x266   :  { %v841_v14 = vpop.f32.mrb[23].mxu1 }
 0x26b   :  { %v2644_v18 = vpop.f32.mrb[24].mxu1 }
 0x26c   :  { %v2646_v23 = vpop.f32.mrb[25].mxu1 }
 0x26d   :  { %v2648_v17 = vpop.f32.mrb[26].mxu1 }
 0x26e   :  { %v2650_v20 = vpop.f32.mrb[27].mxu1 }
 0x273   :  { %v2652_v24 = vpop.f32.mrb[28].mxu1 }
 0x274   :  { %v2654_v62 = vpop.f32.mrb[29].mxu1 }
 0x275   :  { %v2656_v22 = vpop.f32.mrb[30].mxu1 }
 0x276   :  { %v2658_v38 = vpop.f32.mrb[31].mxu1 }
 0x27d   :  { %v1898_v27 = vpop.f32.mrb[32].mxu0 }
 0x27e   :  { %v983_v2 = vpop.f32.mrb[33].mxu0  ;;  %v1209_v31 = vsub.f32 %v1866_v19, %v1898_v27 }
 0x27f   :  { %v1207_v39 = vsub.f32 %v822_v12, %v983_v2  ;;  %v1899_v60 = vpop.f32.mrb[34].mxu0  ;;  %v1930_v25 = vpop.f32.mrb[32].mxu1 }
 0x280   :  { %v1210_v33 = vsub.f32 %v1867_v21, %v1899_v60  ;;  %v1225_v26 = vsub.f32 %v1930_v25, %v1866_v19  ;;  %v986_v35 = vpop.f32.mrb[35].mxu0  ;;  %v1144_v55 = vpop.f32.mrb[33].mxu1  ;;  %v1257_v5 = vmul.f32 %v1209_v31, %v1209_v31 }
 0x281   :  { %v1208_v29 = vsub.f32 %v825_v42, %v986_v35  ;;  %v1223_v37 = vsub.f32 %v1144_v55, %v822_v12  ;;  %v1931_v28 = vpop.f32.mrb[34].mxu1  ;;  %v1255_v36 = vmul.f32 %v1207_v39, %v1207_v39 }
 0x282   :  { %v1226_v30 = vsub.f32 %v1931_v28, %v1867_v21  ;;  %v1147_v61 = vpop.f32.mrb[35].mxu1  ;;  %1275 = vadd.xlane.f32.xlu0 %v1257_v5  ;;  %v1241_v32 = vsub.f32 %v1225_v26, %v1898_v27  ;;  %v1258_v47 = vmul.f32 %v1210_v33, %v1210_v33 }
 0x283   :  { %v1224_v34 = vsub.f32 %v1147_v61, %v825_v42  ;;  %v1239_v7 = vsub.f32 %v1223_v37, %v983_v2  ;;  %v1256_v16 = vmul.f32 %v1208_v29, %v1208_v29 }
 0x284   :  { %v1321_v43 = vmul.f32 %v1241_v32, %v1241_v32  ;;  %v1242_v1 = vsub.f32 %v1226_v30, %v1899_v60 }
 0x285   :  { %v1902_v45 = vpop.f32.mrb[36].mxu0  ;;  %v1240_v63 = vsub.f32 %v1224_v34, %v986_v35  ;;  %v1319_v46 = vmul.f32 %v1239_v7, %v1239_v7 }
 0x286   :  { %v1213_v48 = vsub.f32 %v1870_v9, %v1902_v45  ;;  %1339 = vadd.xlane.f32.xlu1 %v1321_v43  ;;  %1271 = vadd.xlane.f32.xlu0 %v1255_v36  ;;  %v999_v54 = vpop.f32.mrb[37].mxu0  ;;  %v1322_v58 = vmul.f32 %v1242_v1, %v1242_v1 }
 0x287   :  { %v1211_v4 = vsub.f32 %v838_v15, %v999_v54  ;;  %v1903_v40 = vpop.f32.mrb[38].mxu0  ;;  %v1934_v51 = vpop.f32.mrb[36].mxu1  ;;  %v1320_v2 = vmul.f32 %v1240_v63, %v1240_v63 }
 0x288   :  { %v1214_v44 = vsub.f32 %v1871_v10, %v1903_v40  ;;  %v1229_v53 = vsub.f32 %v1934_v51, %v1870_v9  ;;  %v1002_v3 = vpop.f32.mrb[39].mxu0  ;;  %v1160_v6 = vpop.f32.mrb[37].mxu1  ;;  %v1261_v31 = vmul.f32 %v1213_v48, %v1213_v48 }
 0x289   :  { %v2660_v49 = vsub.f32 %v841_v14, %v1002_v3  ;;  %v1227_v50 = vsub.f32 %v1160_v6, %v838_v15  ;;  %v1935_v52 = vpop.f32.mrb[38].mxu1 }
 0x28a   :  { %v1230_v0 = vsub.f32 %v1935_v52, %v1871_v10  ;;  %v1163_v56 = vpop.f32.mrb[39].mxu1  ;;  %1335 = vadd.xlane.f32.xlu1 %v1319_v46  ;;  %1277 = vadd.xlane.f32.xlu0 %v1258_v47  ;;  %v1245_v8 = vsub.f32 %v1229_v53, %v1902_v45  ;;  %v1262_v45 = vmul.f32 %v1214_v44, %v1214_v44 }
 0x28b   :  { %v1228_v57 = vsub.f32 %v1163_v56, %v841_v14  ;;  %v1243_v13 = vsub.f32 %v1227_v50, %v999_v54 }
 0x28c   :  { %v1246_v59 = vsub.f32 %v1230_v0, %v1903_v40  ;;  %v1325_v29 = vmul.f32 %v1245_v8, %v1245_v8 }
 0x28d   :  { %v1906_v41 = vpop.f32.mrb[40].mxu0  ;;  %v1244_v11 = vsub.f32 %v1228_v57, %v1002_v3  ;;  %v1323_v1 = vmul.f32 %v1243_v13, %v1243_v13 }
 0x28e   :  { %v1217_v19 = vsub.f32 %v2644_v18, %v1906_v41  ;;  %1341 = vadd.xlane.f32.xlu1 %v1322_v58  ;;  %1273 = vadd.xlane.f32.xlu0 %v1256_v16  ;;  %v1015_v12 = vpop.f32.mrb[41].mxu0  ;;  %v1326_v6 = vmul.f32 %v1246_v59, %v1246_v59 }
 0x28f   :  { %v1215_v21 = vsub.f32 %v2646_v23, %v1015_v12  ;;  %v1907_v42 = vpop.f32.mrb[42].mxu0  ;;  %v1938_v9 = vpop.f32.mrb[40].mxu1  ;;  %v1324_v47 = vmul.f32 %v1244_v11, %v1244_v11 }
 0x290   :  { %v1218_v15 = vsub.f32 %v2648_v17, %v1907_v42  ;;  %v1233_v10 = vsub.f32 %v1938_v9, %v2644_v18  ;;  %v1018_v14 = vpop.f32.mrb[43].mxu0  ;;  %v1176_v27 = vpop.f32.mrb[41].mxu1  ;;  %v1259_v18 = vmul.f32 %v1211_v4, %v1211_v4 }
 0x291   :  { %v1216_v39 = vsub.f32 %v2650_v20, %v1018_v14  ;;  %v1231_v60 = vsub.f32 %v1176_v27, %v2646_v23  ;;  %v1939_v25 = vpop.f32.mrb[42].mxu1  ;;  %v1263_v50 = vmul.f32 %v1215_v21, %v1215_v21 }
 0x292   :  { %v1234_v33 = vsub.f32 %v1939_v25, %v2648_v17  ;;  %v1179_v26 = vpop.f32.mrb[43].mxu1  ;;  %1337 = vadd.xlane.f32.xlu1 %v1320_v2  ;;  %1283 = vadd.xlane.f32.xlu0 %v1261_v31  ;;  %v1249_v35 = vsub.f32 %v1233_v10, %v1906_v41  ;;  %v1266_v0 = vmul.f32 %v1218_v15, %v1218_v15 }
 0x293   :  { %v1232_v55 = vsub.f32 %v1179_v26, %v2650_v20  ;;  %v1247_v5 = vsub.f32 %v1231_v60, %v1015_v12  ;;  %v1264_v56 = vmul.f32 %v1216_v39, %v1216_v39 }
 0x294   :  { %v1250_v37 = vsub.f32 %v1234_v33, %v1907_v42 }
 0x295   :  { %v1910_v28 = vpop.f32.mrb[44].mxu0  ;;  %v1248_v30 = vsub.f32 %v1232_v55, %v1018_v14  ;;  %v1327_v52 = vmul.f32 %v1247_v5, %v1247_v5 }
 0x296   :  { %v1221_v61 = vsub.f32 %v2652_v24, %v1910_v28  ;;  %1347 = vadd.xlane.f32.xlu1 %v1325_v29  ;;  %1279 = vadd.xlane.f32.xlu0 %v1259_v18  ;;  %v1031_v23 = vpop.f32.mrb[45].mxu0 }
 0x297   :  { %v1219_v32 = vsub.f32 %v2654_v62, %v1031_v23  ;;  %v1911_v17 = vpop.f32.mrb[46].mxu0  ;;  %v1942_v34 = vpop.f32.mrb[44].mxu1 }
 0x298   :  { %v1222_v7 = vsub.f32 %v2656_v22, %v1911_v17  ;;  %v1237_v43 = vsub.f32 %v1942_v34, %v2652_v24  ;;  %v1034_v20 = vpop.f32.mrb[47].mxu0  ;;  %v1192_v36 = vpop.f32.mrb[45].mxu1  ;;  %v1260_v24 = vmul.f32 %v2660_v49, %v2660_v49  ;;  %v1328_v49 = vmul.f32 %v1248_v30, %v1248_v30 }
 0x299   :  { %v1220_v63 = vsub.f32 %v2658_v38, %v1034_v20  ;;  %v1235_v48 = vsub.f32 %v1192_v36, %v2654_v62  ;;  %v1943_v54 = vpop.f32.mrb[46].mxu1  ;;  %v1265_v62 = vmul.f32 %v1217_v19, %v1217_v19  ;;  %v1269_v8 = vmul.f32 %v1221_v61, %v1221_v61 }
 0x29a   :  { %v1238_v4 = vsub.f32 %v1943_v54, %v2656_v22  ;;  %v1195_v40 = vpop.f32.mrb[47].mxu1  ;;  %1343 = vadd.xlane.f32.xlu1 %v1323_v1  ;;  %1285 = vadd.xlane.f32.xlu0 %v1262_v45  ;;  %v1253_v51 = vsub.f32 %v1237_v43, %v1910_v28  ;;  %v1329_v22 = vmul.f32 %v1249_v35, %v1249_v35  ;;  %v2247_v19 = vmov 0.0  }
 0x29b   :  { %v1236_v53 = vsub.f32 %v1195_v40, %v2658_v38  ;;  %v1251_v3 = vsub.f32 %v1235_v48, %v1031_v23  ;;  %v1330_v38 = vmul.f32 %v1250_v37, %v1250_v37  ;;  %v1267_v13 = vmul.f32 %v1219_v32, %v1219_v32  ;;  %131 = vst.msk [vmem:[#allocation2] sm:$0x1] %vm130_vm1, %v2247_v19 }
 0x29c   :  { %v1254_v46 = vsub.f32 %v1238_v4, %v1911_v17  ;;  %v1333_v57 = vmul.f32 %v1253_v51, %v1253_v51  ;;  %v1268_v58 = vmul.f32 %v1220_v63, %v1220_v63  ;;  %v1270_v41 = vmul.f32 %v1222_v7, %v1222_v7 }
 0x29d   :  { %v1252_v44 = vsub.f32 %v1236_v53, %v1034_v20  ;;  %v1331_v16 = vmul.f32 %v1251_v3, %v1251_v3 }
 0x29e   :  { %1349 = vadd.xlane.f32.xlu1 %v1326_v6  ;;  %1281 = vadd.xlane.f32.xlu0 %v1260_v24  ;;  %v1334_v11 = vmul.f32 %v1254_v46, %v1254_v46 }
 0x29f   :  { %v1332_v59 = vmul.f32 %v1252_v44, %v1252_v44 }
 0x2a2   :  { %1345 = vadd.xlane.f32.xlu1 %v1324_v47  ;;  %1291 = vadd.xlane.f32.xlu0 %v1265_v62 }
 0x2a6   :  { %1355 = vadd.xlane.f32.xlu1 %v1329_v22  ;;  %1287 = vadd.xlane.f32.xlu0 %v1263_v50 }
 0x2aa   :  { %1351 = vadd.xlane.f32.xlu1 %v1327_v52  ;;  %1293 = vadd.xlane.f32.xlu0 %v1266_v0 }
 0x2ae   :  { %1357 = vadd.xlane.f32.xlu1 %v1330_v38  ;;  %1289 = vadd.xlane.f32.xlu0 %v1264_v56 }
 0x2b2   :  { %1353 = vadd.xlane.f32.xlu1 %v1328_v49  ;;  %1299 = vadd.xlane.f32.xlu0 %v1269_v8 }
 0x2b6   :  { %1363 = vadd.xlane.f32.xlu1 %v1333_v57  ;;  %1295 = vadd.xlane.f32.xlu0 %v1267_v13 }
 0x2ba   :  { %1359 = vadd.xlane.f32.xlu1 %v1331_v16  ;;  %1297 = vadd.xlane.f32.xlu0 %v1268_v58 }
 0x2be   :  { %1361 = vadd.xlane.f32.xlu1 %v1332_v59  ;;  %1301 = vadd.xlane.f32.xlu0 %v1270_v41 }
 0x2c2   :  { %1365 = vadd.xlane.f32.xlu1 %v1334_v11 }
 0x30f   :  { %v1276_v12 = vpop.xlane.xlu0 %1275 }
 0x310   :  { %v2681_v9 = vmul.f32 0.11111111, %v1276_v12 }
 0x312   :  { %1985 = vrsqrt.f32 %v2681_v9  ;;  %vm1399_vm2 = vcmp.eq.f32.partialorder %v2681_v9, inf  ;;  %vm1401_vm3 = vcmp.eq.f32.partialorder %v2681_v9, 0.0  ;;  %v1402_v34 = vand.u32 2147483648, %v2681_v9 }
 0x313   :  { %v1340_v21 = vpop.xlane.xlu1 %1339  ;;  %v1272_v42 = vpop.xlane.xlu0 %1271 }
 0x314   :  { %v2683_v14 = vmul.f32 0.11111111, %v1340_v21  ;;  %v2686_v27 = vmul.f32 0.11111111, %v1272_v42 }
 0x316   :  { %1987 = vrsqrt.f32 %v2683_v14  ;;  %vm1511_vm4 = vcmp.eq.f32.partialorder %v2683_v14, inf  ;;  %vm1513_vm5 = vcmp.eq.f32.partialorder %v2683_v14, 0.0  ;;  %v1514_v20 = vand.u32 2147483648, %v2683_v14 }
 0x317   :  { %v1336_v15 = vpop.xlane.xlu1 %1335  ;;  %v1278_v10 = vpop.xlane.xlu0 %1277  ;;  %1989 = vrsqrt.f32 %v2686_v27  ;;  %vm1385_vm6 = vcmp.eq.f32.partialorder %v2686_v27, inf  ;;  %v1388_v45 = vand.u32 2147483648, %v2686_v27  ;;  %vm1387_vm7 = vcmp.eq.f32.partialorder %v2686_v27, 0.0 }
 0x318   :  { %v2688_v2 = vmul.f32 0.11111111, %v1336_v15  ;;  %v2697_v35 = vmul.f32 0.11111111, %v1278_v10 }
 0x31a   :  { %1991 = vrsqrt.f32 %v2688_v2  ;;  %vm1497_vm8 = vcmp.eq.f32.partialorder %v2688_v2, inf  ;;  %v1500_v54 = vand.u32 2147483648, %v2688_v2  ;;  %v1409_v4 = vand.u32 2147483648, %v2697_v35 }
 0x31b   :  { %v1342_v31 = vpop.xlane.xlu1 %1341  ;;  %v1274_v39 = vpop.xlane.xlu0 %1273  ;;  %vm1499_vm9 = vcmp.eq.f32.partialorder %v2688_v2, 0.0  ;;  %vm1406_vm10 = vcmp.eq.f32.partialorder %v2697_v35, inf  ;;  %vm1408_vm15 = vcmp.eq.f32.partialorder %v2697_v35, 0.0 }
 0x31c   :  { %v2691_v60 = vmul.f32 0.11111111, %v1342_v31  ;;  %v2693_v25 = vmul.f32 0.11111111, %v1274_v39  ;;  %v1986_v5 = vpop.eup %1985 }
 0x31d   :  { %v1398_v30 = vmul.f32 %v1986_v5, %v2681_v9 }
 0x31e   :  { %1993 = vrsqrt.f32 %v2691_v60  ;;  %vm1518_vm11 = vcmp.eq.f32.partialorder %v2691_v60, inf  ;;  %v1521_v6 = vand.u32 2147483648, %v2691_v60  ;;  %vm1392_vm12 = vcmp.eq.f32.partialorder %v2693_v25, inf }
 0x31f   :  { %v1338_v33 = vpop.xlane.xlu1 %1337  ;;  %v1284_v26 = vpop.xlane.xlu0 %1283  ;;  %1995 = vrsqrt.f32 %v2693_v25  ;;  %v1400_v1 = vsel %vm1399_vm2, %v2681_v9, %v1398_v30  ;;  %vm1394_vm13 = vcmp.eq.f32.partialorder %v2693_v25, 0.0  ;;  %vm1520_vm14 = vcmp.eq.f32.partialorder %v2691_v60, 0.0 }
 0x320   :  { %v2700_v55 = vmul.f32 0.11111111, %v1338_v33  ;;  %v2705_v37 = vmul.f32 0.11111111, %v1284_v26  ;;  %v1988_v28 = vpop.eup %1987  ;;  %v1403_v24 = vsel %vm1401_vm3, %v1402_v34, %v1400_v1  ;;  %v1395_v38 = vand.u32 2147483648, %v2693_v25 }
 0x321   :  { %v1990_v17 = vpop.eup %1989  ;;  %v1510_v43 = vmul.f32 %v1988_v28, %v2683_v14 }
 0x322   :  { %1997 = vrsqrt.f32 %v2700_v55  ;;  %v1384_v44 = vmul.f32 %v1990_v17, %v2686_v27  ;;  %vm1504_vm0 = vcmp.eq.f32.partialorder %v2700_v55, inf  ;;  %v1507_v57 = vand.u32 2147483648, %v2700_v55 }
 0x323   :  { %v1348_v29 = vpop.xlane.xlu1 %1347  ;;  %v1280_v18 = vpop.xlane.xlu0 %1279  ;;  %1999 = vrsqrt.f32 %v2697_v35  ;;  %v1512_v46 = vsel %vm1511_vm4, %v2683_v14, %v1510_v43  ;;  %vm1506_vm2 = vcmp.eq.f32.partialorder %v2700_v55, 0.0  ;;  %vm1427_vm3 = vcmp.eq.f32.partialorder %v2705_v37, inf }
 0x324   :  { %v2708_v61 = vmul.f32 0.11111111, %v1348_v29  ;;  %v1992_v7 = vpop.eup %1991  ;;  %2001 = vrsqrt.f32 %v2705_v37  ;;  %v2722_v63 = vmul.f32 0.11111111, %v1280_v18  ;;  %v1515_v16 = vsel %vm1513_vm5, %v1514_v20, %v1512_v46 }
 0x325   :  { %v1496_v22 = vmul.f32 %v1992_v7, %v2688_v2  ;;  %v1386_v59 = vsel %vm1385_vm6, %v2686_v27, %v1384_v44  ;;  %v1609_v31 = vadd.f32 %v1515_v16, %v1403_v24  ;;  %vm1429_vm4 = vcmp.eq.f32.partialorder %v2705_v37, 0.0 }
 0x326   :  { %2003 = vrsqrt.f32 %v2708_v61  ;;  %v1389_v39 = vsel %vm1387_vm7, %v1388_v45, %v1386_v59  ;;  %v1430_v33 = vand.u32 2147483648, %v2705_v37  ;;  %vm1539_vm5 = vcmp.eq.f32.partialorder %v2708_v61, inf }
 0x327   :  { %v1344_v23 = vpop.xlane.xlu1 %1343  ;;  %v1286_v32 = vpop.xlane.xlu0 %1285  ;;  %2005 = vrsqrt.f32 %v2722_v63  ;;  %v1498_v19 = vsel %vm1497_vm8, %v2688_v2, %v1496_v22  ;;  %vm1541_vm6 = vcmp.eq.f32.partialorder %v2708_v61, 0.0  ;;  %v1542_v30 = vand.u32 2147483648, %v2708_v61 }
 0x328   :  { %v1994_v36 = vpop.eup %1993  ;;  %v2728_v40 = vmul.f32 0.11111111, %v1344_v23  ;;  %v2747_v52 = vmul.f32 0.11111111, %v1286_v32  ;;  %v1501_v26 = vsel %vm1499_vm9, %v1500_v54, %v1498_v19  ;;  %vm1413_vm7 = vcmp.eq.f32.partialorder %v2722_v63, inf }
 0x329   :  { %v1996_v48 = vpop.eup %1995  ;;  %v1517_v0 = vmul.f32 %v1994_v36, %v2691_v60  ;;  %v1607_v17 = vadd.f32 %v1501_v26, %v1389_v39  ;;  %vm1415_vm8 = vcmp.eq.f32.partialorder %v2722_v63, 0.0  ;;  %v1416_v20 = vand.u32 2147483648, %v2722_v63 }
 0x32a   :  { %v1391_v50 = vmul.f32 %v1996_v48, %v2693_v25  ;;  %2007 = vrsqrt.f32 %v2728_v40  ;;  %vm1525_vm9 = vcmp.eq.f32.partialorder %v2728_v40, inf  ;;  %v1528_v54 = vand.u32 2147483648, %v2728_v40 }
 0x32b   :  { %v1350_v51 = vpop.xlane.xlu1 %1349  ;;  %v1282_v53 = vpop.xlane.xlu0 %1281  ;;  %2009 = vrsqrt.f32 %v2747_v52  ;;  %v1519_v42 = vsel %vm1518_vm11, %v2691_v60, %v1517_v0  ;;  %vm1434_vm11 = vcmp.eq.f32.partialorder %v2747_v52, inf }
 0x32c   :  { %v1998_v3 = vpop.eup %1997  ;;  %v2756_v13 = vmul.f32 0.11111111, %v1282_v53  ;;  %v2766_v11 = vmul.f32 0.11111111, %v1350_v51  ;;  %v1393_v12 = vsel %vm1392_vm12, %v2693_v25, %v1391_v50  ;;  %v1522_v27 = vsel %vm1520_vm14, %v1521_v6, %v1519_v42 }
 0x32d   :  { %v1503_v47 = vmul.f32 %v1998_v3, %v2700_v55  ;;  %v2000_v62 = vpop.eup %1999  ;;  %v1396_v5 = vsel %vm1394_vm13, %v1395_v38, %v1393_v12  ;;  %v1437_v6 = vand.u32 2147483648, %v2747_v52  ;;  %vm1436_vm13 = vcmp.eq.f32.partialorder %v2747_v52, 0.0 }
 0x32e   :  { %v1405_v41 = vmul.f32 %v2000_v62, %v2697_v35  ;;  %v2002_v21 = vpop.eup %2001  ;;  %2011 = vrsqrt.f32 %v2756_v13  ;;  %vm1546_vm12 = vcmp.eq.f32.partialorder %v2766_v11, inf  ;;  %vm1420_vm14 = vcmp.eq.f32.partialorder %v2756_v13, inf }
 0x32f   :  { %v1346_v56 = vpop.xlane.xlu1 %1345  ;;  %v1292_v49 = vpop.xlane.xlu0 %1291  ;;  %v1505_v8 = vsel %vm1504_vm0, %v2700_v55, %v1503_v47  ;;  %v1426_v18 = vmul.f32 %v2002_v21, %v2705_v37  ;;  %v1549_v47 = vand.u32 2147483648, %v2766_v11  ;;  %vm1548_vm0 = vcmp.eq.f32.partialorder %v2766_v11, 0.0 }
 0x330   :  { %v2758_v58 = vmul.f32 0.11111111, %v1346_v56  ;;  %v1508_v9 = vsel %vm1506_vm2, %v1507_v57, %v1505_v8  ;;  %v2004_v14 = vpop.eup %2003  ;;  %v1407_v55 = vsel %vm1406_vm10, %v2697_v35, %v1405_v41  ;;  %v2797_v28 = vmul.f32 0.11111111, %v1292_v49 }
 0x331   :  { %v1608_v29 = vadd.f32 %v1508_v9, %v1396_v5  ;;  %v1538_v2 = vmul.f32 %v2004_v14, %v2708_v61  ;;  %v2006_v32 = vpop.eup %2005  ;;  %v1410_v60 = vsel %vm1408_vm15, %v1409_v4, %v1407_v55  ;;  %v1428_v35 = vsel %vm1427_vm3, %v2705_v37, %v1426_v18 }
 0x332   :  { %2013 = vrsqrt.f32 %v2758_v58  ;;  %v1610_v43 = vadd.f32 %v1522_v27, %v1410_v60  ;;  %vm1527_vm10 = vcmp.eq.f32.partialorder %v2728_v40, 0.0  ;;  %v1412_v48 = vmul.f32 %v2006_v32, %v2722_v63 }
 0x333   :  { %v1356_v15 = vpop.xlane.xlu1 %1355  ;;  %v1288_v10 = vpop.xlane.xlu0 %1287  ;;  %2015 = vrsqrt.f32 %v2766_v11  ;;  %v1623_v1 = vadd.f32 %v1608_v29, %v1607_v17  ;;  %v1540_v45 = vsel %vm1539_vm5, %v2708_v61, %v1538_v2  ;;  %v1431_v44 = vsel %vm1429_vm4, %v1430_v33, %v1428_v35 }
 0x334   :  { %v2808_v34 = vmul.f32 0.11111111, %v1356_v15  ;;  %v2008_v7 = vpop.eup %2007  ;;  %v2813_v36 = vmul.f32 0.11111111, %v1288_v10  ;;  %2017 = vrsqrt.f32 %v2797_v28  ;;  %v1543_v50 = vsel %vm1541_vm6, %v1542_v30, %v1540_v45 }
 0x335   :  { %v2010_v53 = vpop.eup %2009  ;;  %v1524_v3 = vmul.f32 %v2008_v7, %v2728_v40  ;;  %v1624_v22 = vadd.f32 %v1623_v1, %v1609_v31  ;;  %v1414_v37 = vsel %vm1413_vm7, %v2722_v63, %v1412_v48  ;;  %vm1422_vm15 = vcmp.eq.f32.partialorder %v2756_v13, 0.0 }
 0x336   :  { %2019 = vrsqrt.f32 %v2808_v34  ;;  %v1433_v57 = vmul.f32 %v2010_v53, %v2747_v52  ;;  %v1423_v16 = vand.u32 2147483648, %v2756_v13  ;;  %v2856_v41 = vadd.f32 %v1543_v50, %v1431_v44 }
 0x337   :  { %v1352_v25 = vpop.xlane.xlu1 %1351  ;;  %v1294_v23 = vpop.xlane.xlu0 %1293  ;;  %2021 = vrsqrt.f32 %v2813_v36  ;;  %v1526_v8 = vsel %vm1525_vm9, %v2728_v40, %v1524_v3  ;;  %vm1532_vm2 = vcmp.eq.f32.partialorder %v2758_v58, inf  ;;  %vm1534_vm3 = vcmp.eq.f32.partialorder %v2758_v58, 0.0 }
 0x338   :  { %v2829_v24 = vmul.f32 0.11111111, %v1352_v25  ;;  %v2012_v46 = vpop.eup %2011  ;;  %v2854_v59 = vmul.f32 0.11111111, %v1294_v23  ;;  %v1417_v12 = vsel %vm1415_vm8, %v1416_v20, %v1414_v37  ;;  %v1625_v21 = vadd.f32 %v1624_v22, %v1610_v43 }
 0x339   :  { %v1419_v19 = vmul.f32 %v2012_v46, %v2756_v13  ;;  %v1535_v9 = vand.u32 2147483648, %v2758_v58  ;;  %v1529_v15 = vsel %vm1527_vm10, %v1528_v54, %v1526_v8  ;;  %v1435_v63 = vsel %vm1434_vm11, %v2747_v52, %v1433_v57 }
 0x33a   :  { %2023 = vrsqrt.f32 %v2829_v24  ;;  %vm1455_vm4 = vcmp.eq.f32.partialorder %v2797_v28, inf  ;;  %vm1457_vm5 = vcmp.eq.f32.partialorder %v2797_v28, 0.0  ;;  %v1458_v55 = vand.u32 2147483648, %v2797_v28 }
 0x33b   :  { %v1358_v4 = vpop.xlane.xlu1 %1357  ;;  %v1290_v51 = vpop.xlane.xlu0 %1289  ;;  %v1421_v40 = vsel %vm1420_vm14, %v2756_v13, %v1419_v19  ;;  %v1611_v27 = vadd.f32 %v1529_v15, %v1417_v12  ;;  %vm1567_vm6 = vcmp.eq.f32.partialorder %v2808_v34, inf  ;;  %v1438_v30 = vsel %vm1436_vm13, %v1437_v6, %v1435_v63 }
 0x33c   :  { %v2014_v62 = vpop.eup %2013  ;;  %v2846_v56 = vmul.f32 0.11111111, %v1358_v4  ;;  %v2869_v14 = vmul.f32 0.11111111, %v1290_v51  ;;  %v1570_v23 = vand.u32 2147483648, %v2808_v34  ;;  %vm1441_vm7 = vcmp.eq.f32.partialorder %v2813_v36, inf }
 0x33d   :  { %v2016_v0 = vpop.eup %2015  ;;  %v1531_v38 = vmul.f32 %v2014_v62, %v2758_v58  ;;  %v1424_v7 = vsel %vm1422_vm15, %v1423_v16, %v1421_v40  ;;  %vm1569_vm8 = vcmp.eq.f32.partialorder %v2808_v34, 0.0  ;;  %vm1443_vm9 = vcmp.eq.f32.partialorder %v2813_v36, 0.0 }
 0x33e   :  { %v1545_v42 = vmul.f32 %v2016_v0, %v2766_v11  ;;  %2025 = vrsqrt.f32 %v2846_v56  ;;  %v2018_v33 = vpop.eup %2017  ;;  %v1626_v13 = vadd.f32 %v1625_v21, %v1611_v27  ;;  %vm1553_vm10 = vcmp.eq.f32.partialorder %v2829_v24, inf }
 0x33f   :  { %v1354_v49 = vpop.xlane.xlu1 %1353  ;;  %v1300_v61 = vpop.xlane.xlu0 %1299  ;;  %v1533_v10 = vsel %vm1532_vm2, %v2758_v58, %v1531_v38  ;;  %2027 = vrsqrt.f32 %v2854_v59  ;;  %v1454_v25 = vmul.f32 %v2018_v33, %v2797_v28  ;;  %v1444_v58 = vand.u32 2147483648, %v2813_v36 }
 0x340   :  { %v2876_v26 = vmul.f32 0.11111111, %v1354_v49  ;;  %2029 = vrsqrt.f32 %v2869_v14  ;;  %v2020_v5 = vpop.eup %2019  ;;  %v1547_v29 = vsel %vm1546_vm12, %v2766_v11, %v1545_v42  ;;  %v1536_v18 = vsel %vm1534_vm3, %v1535_v9, %v1533_v10 }
 0x341   :  { %v2022_v2 = vpop.eup %2021  ;;  %v1550_v43 = vsel %vm1548_vm0, %v1549_v47, %v1547_v29  ;;  %v1612_v20 = vadd.f32 %v1536_v18, %v1424_v7  ;;  %v1566_v45 = vmul.f32 %v2020_v5, %v2808_v34  ;;  %v1456_v54 = vsel %vm1455_vm4, %v2797_v28, %v1454_v25 }
 0x342   :  { %2031 = vrsqrt.f32 %v2876_v26  ;;  %v1440_v48 = vmul.f32 %v2022_v2, %v2813_v36  ;;  %vm1555_vm11 = vcmp.eq.f32.partialorder %v2829_v24, 0.0  ;;  %v1556_v11 = vand.u32 2147483648, %v2829_v24 }
 0x343   :  { %v1364_v31 = vpop.xlane.xlu1 %1363  ;;  %v1296_v39 = vpop.xlane.xlu0 %1295  ;;  %v2916_v4 = vmul.f32 0.11111111, %v1300_v61  ;;  %v1614_v51 = vadd.f32 %v1550_v43, %v1438_v30  ;;  %v1465_v3 = vand.u32 2147483648, %v2854_v59  ;;  %v1627_v46 = vadd.f32 %v1626_v13, %v1612_v20 }
 0x344   :  { %v2024_v60 = vpop.eup %2023  ;;  %v2900_v52 = vmul.f32 0.11111111, %v1364_v31  ;;  %v2906_v35 = vmul.f32 0.11111111, %v1296_v39  ;;  %vm1462_vm12 = vcmp.eq.f32.partialorder %v2854_v59, inf  ;;  %vm1574_vm13 = vcmp.eq.f32.partialorder %v2846_v56, inf }
 0x345   :  { %v1552_v1 = vmul.f32 %v2024_v60, %v2829_v24  ;;  %v1577_v44 = vand.u32 2147483648, %v2846_v56  ;;  %v1459_v50 = vsel %vm1457_vm5, %v1458_v55, %v1456_v54  ;;  %v1568_v0 = vsel %vm1567_vm6, %v2808_v34, %v1566_v45 }
 0x346   :  { %2033 = vrsqrt.f32 %v2900_v52  ;;  %v1442_v37 = vsel %vm1441_vm7, %v2813_v36, %v1440_v48  ;;  %vm1576_vm14 = vcmp.eq.f32.partialorder %v2846_v56, 0.0  ;;  %vm1448_vm15 = vcmp.eq.f32.partialorder %v2869_v14, inf }
 0x347   :  { %v1360_v32 = vpop.xlane.xlu1 %1359  ;;  %v1298_v17 = vpop.xlane.xlu0 %1297  ;;  %v1554_v53 = vsel %vm1553_vm10, %v2829_v24, %v1552_v1  ;;  %2035 = vrsqrt.f32 %v2906_v35  ;;  %vm1464_vm0 = vcmp.eq.f32.partialorder %v2854_v59, 0.0  ;;  %v1628_v12 = vadd.f32 %v1627_v46, %v2856_v41 }
 0x348   :  { %v2026_v6 = vpop.eup %2025  ;;  %v1557_v49 = vsel %vm1555_vm11, %v1556_v11, %v1554_v53  ;;  %2037 = vrsqrt.f32 %v2916_v4  ;;  %v2938_v28 = vmul.f32 0.11111111, %v1360_v32  ;;  %v2940_v61 = vmul.f32 0.11111111, %v1298_v17 }
 0x349   :  { %v2028_v22 = vpop.eup %2027  ;;  %v1573_v8 = vmul.f32 %v2026_v6, %v2846_v56  ;;  %v1571_v24 = vsel %vm1569_vm8, %v1570_v23, %v1568_v0  ;;  %vm1450_vm2 = vcmp.eq.f32.partialorder %v2869_v14, 0.0  ;;  %v1445_v42 = vsel %vm1443_vm9, %v1444_v58, %v1442_v37 }
 0x34a   :  { %v2030_v38 = vpop.eup %2029  ;;  %2039 = vrsqrt.f32 %v2938_v28  ;;  %v1461_v9 = vmul.f32 %v2028_v22, %v2854_v59  ;;  %v1451_v15 = vand.u32 2147483648, %v2869_v14  ;;  %v1615_v10 = vadd.f32 %v1557_v49, %v1445_v42 }
 0x34b   :  { %v1362_v47 = vpop.xlane.xlu1 %1361  ;;  %v1302_v62 = vpop.xlane.xlu0 %1301  ;;  %v1447_v57 = vmul.f32 %v2030_v38, %v2869_v14  ;;  %2041 = vrsqrt.f32 %v2940_v61  ;;  %v1575_v36 = vsel %vm1574_vm13, %v2846_v56, %v1573_v8  ;;  %vm1560_vm3 = vcmp.eq.f32.partialorder %v2876_v26, inf }
 0x34c   :  { %v2945_v16 = vmul.f32 0.11111111, %v1362_v47  ;;  %v2947_v19 = vmul.f32 0.11111111, %v1302_v62  ;;  %v2032_v21 = vpop.eup %2031  ;;  %v1563_v39 = vand.u32 2147483648, %v2876_v26  ;;  %v1617_v33 = vadd.f32 %v1571_v24, %v1459_v50 }
 0x34d   :  { %v1449_v34 = vsel %vm1448_vm15, %v2869_v14, %v1447_v57  ;;  %v1559_v41 = vmul.f32 %v2032_v21, %v2876_v26  ;;  %v1629_v63 = vadd.f32 %v1628_v12, %v1614_v51  ;;  %vm1562_vm4 = vcmp.eq.f32.partialorder %v2876_v26, 0.0 }
 0x34e   :  { %2043 = vrsqrt.f32 %v2945_v16  ;;  %v1463_v5 = vsel %vm1462_vm12, %v2854_v59, %v1461_v9  ;;  %v1452_v27 = vsel %vm1450_vm2, %v1451_v15, %v1449_v34  ;;  %v1578_v25 = vsel %vm1576_vm14, %v1577_v44, %v1575_v36 }
 0x34f   :  { %v1366_v31 = vpop.xlane.xlu1 %1365  ;;  %2045 = vrsqrt.f32 %v2947_v19  ;;  %v1561_v40 = vsel %vm1560_vm3, %v2876_v26, %v1559_v41  ;;  %v1630_v30 = vadd.f32 %v1629_v63, %v1615_v10  ;;  %vm1483_vm5 = vcmp.eq.f32.partialorder %v2916_v4, inf }
 0x350   :  { %v2034_v55 = vpop.eup %2033  ;;  %v1564_v29 = vsel %vm1562_vm4, %v1563_v39, %v1561_v40  ;;  %v2977_v18 = vmul.f32 0.11111111, %v1366_v31  ;;  %vm1595_vm6 = vcmp.eq.f32.partialorder %v2900_v52, inf  ;;  %vm1597_vm7 = vcmp.eq.f32.partialorder %v2900_v52, 0.0 }
 0x351   :  { %v2036_v2 = vpop.eup %2035  ;;  %v1616_v23 = vadd.f32 %v1564_v29, %v1452_v27  ;;  %v1598_v26 = vand.u32 2147483648, %v2900_v52  ;;  %v1466_v56 = vsel %vm1464_vm0, %v1465_v3, %v1463_v5  ;;  %vm1469_vm8 = vcmp.eq.f32.partialorder %v2906_v35, inf  ;;  %v1644_v27 = vld [vmem:[#allocation2] sm:$0x1] }
 0x352   :  { %v1468_v14 = vmul.f32 %v2036_v2, %v2906_v35  ;;  %2047 = vrsqrt.f32 %v2977_v18  ;;  %v2038_v32 = vpop.eup %2037  ;;  %vm1471_vm9 = vcmp.eq.f32.partialorder %v2906_v35, 0.0  ;;  %v1618_v60 = vadd.f32 %v1578_v25, %v1466_v56 }
 0x353   :  { %v1631_v17 = vadd.f32 %v1630_v30, %v1616_v23  ;;  %v1594_v7 = vmul.f32 %v2034_v55, %v2900_v52  ;;  %v1472_v58 = vand.u32 2147483648, %v2906_v35  ;;  %vm1581_vm10 = vcmp.eq.f32.partialorder %v2938_v28, inf }
 0x354   :  { %v2040_v43 = vpop.eup %2039  ;;  %vm1583_vm11 = vcmp.eq.f32.partialorder %v2938_v28, 0.0  ;;  %v1584_v20 = vand.u32 2147483648, %v2938_v28  ;;  %vm1476_vm12 = vcmp.eq.f32.partialorder %v2940_v61, inf  ;;  %vm1478_vm13 = vcmp.eq.f32.partialorder %v2940_v61, 0.0 }
 0x355   :  { %v2042_v59 = vpop.eup %2041  ;;  %v1632_v1 = vadd.f32 %v1631_v17, %v1617_v33  ;;  %v1482_v13 = vmul.f32 %v2038_v32, %v2916_v4  ;;  %v1470_v45 = vsel %vm1469_vm8, %v2906_v35, %v1468_v14  ;;  %v1580_v48 = vmul.f32 %v2040_v43, %v2938_v28 }
 0x356   :  { %v1475_v11 = vmul.f32 %v2042_v59, %v2940_v61  ;;  %v1479_v51 = vand.u32 2147483648, %v2940_v61  ;;  %vm1588_vm14 = vcmp.eq.f32.partialorder %v2945_v16, inf  ;;  %vm1590_vm15 = vcmp.eq.f32.partialorder %v2945_v16, 0.0 }
 0x357   :  { %v1596_v3 = vsel %vm1595_vm6, %v2900_v52, %v1594_v7  ;;  %v1582_v6 = vsel %vm1581_vm10, %v2938_v28, %v1580_v48  ;;  %v1591_v44 = vand.u32 2147483648, %v2945_v16  ;;  %v1473_v47 = vsel %vm1471_vm9, %v1472_v58, %v1470_v45 }
 0x358   :  { %v2044_v54 = vpop.eup %2043  ;;  %v1585_v62 = vsel %vm1583_vm11, %v1584_v20, %v1582_v6  ;;  %v1477_v22 = vsel %vm1476_vm12, %v2940_v61, %v1475_v11  ;;  %v1484_v0 = vsel %vm1483_vm5, %v2916_v4, %v1482_v13  ;;  %v1633_v37 = vadd.f32 %v1632_v1, %v1618_v60 }
 0x359   :  { %v2046_v53 = vpop.eup %2045  ;;  %v1587_v46 = vmul.f32 %v2044_v54, %v2945_v16  ;;  %v1619_v38 = vadd.f32 %v1585_v62, %v1473_v47  ;;  %v1486_v35 = vand.u32 2147483648, %v2916_v4  ;;  %v1599_v28 = vsel %vm1597_vm7, %v1598_v26, %v1596_v3 }
 0x35a   :  { %v1489_v50 = vmul.f32 %v2046_v53, %v2947_v19  ;;  %v1480_v8 = vsel %vm1478_vm13, %v1479_v51, %v1477_v22  ;;  %vm1485_vm0 = vcmp.eq.f32.partialorder %v2916_v4, 0.0  ;;  %vm1490_vm2 = vcmp.eq.f32.partialorder %v2947_v19, inf }
 0x35b   :  { %v1589_v49 = vsel %vm1588_vm14, %v2945_v16, %v1587_v46  ;;  %v1634_v24 = vadd.f32 %v1633_v37, %v1619_v38  ;;  %v1487_v42 = vsel %vm1485_vm0, %v1486_v35, %v1484_v0  ;;  %v1493_v15 = vand.u32 2147483648, %v2947_v19 }
 0x35c   :  { %v1592_v57 = vsel %vm1590_vm15, %v1591_v44, %v1589_v49  ;;  %v2048_v12 = vpop.eup %2047  ;;  %v1491_v9 = vsel %vm1490_vm2, %v2947_v19, %v1489_v50  ;;  %v1621_v10 = vadd.f32 %v1599_v28, %v1487_v42  ;;  %vm1602_vm3 = vcmp.eq.f32.partialorder %v2977_v18, inf }
 0x35d   :  { %v1620_v21 = vadd.f32 %v1592_v57, %v1480_v8  ;;  %v1601_v52 = vmul.f32 %v2048_v12, %v2977_v18  ;;  %v1605_v16 = vand.u32 2147483648, %v2977_v18  ;;  %vm1492_vm4 = vcmp.eq.f32.partialorder %v2947_v19, 0.0 }
 0x35e   :  { %vm1604_vm5 = vcmp.eq.f32.partialorder %v2977_v18, 0.0  ;;  %v1494_v34 = vsel %vm1492_vm4, %v1493_v15, %v1491_v9 }
 0x35f   :  { %v1635_v61 = vadd.f32 %v1634_v24, %v1620_v21  ;;  %v1603_v4 = vsel %vm1602_vm3, %v2977_v18, %v1601_v52 }
 0x360   :  { %v1606_v41 = vsel %vm1604_vm5, %v1605_v16, %v1603_v4 }
 0x361   :  { %v1636_v31 = vadd.f32 %v1635_v61, %v1621_v10  ;;  %v1622_v36 = vadd.f32 %v1606_v41, %v1494_v34 }
 0x363   :  { %v1637_v39 = vadd.f32 %v1636_v31, %v1622_v36 }
 0x365   :  { %v1638_v33 = vrot.slane %v1637_v39, 4 }
 0x367   :  { %v1639_v63 = vadd.f32 %v1638_v33, %v1637_v39 }
 0x369   :  { %v1640_v40 = vrot.slane %v1639_v63, 2 }
 0x36b   :  { %v1641_v55 = vadd.f32 %v1640_v40, %v1639_v63 }
 0x36d   :  { %v1642_v5 = vrot.slane %v1641_v55, 1 }
 0x36f   :  { %v1643_v29 = vadd.f32 %v1642_v5, %v1641_v55 }
 0x371   :  { %v1645_v2 = vadd.f32 %v1644_v27, %v1643_v29 }
 0x373   :  { %1647 = vst.msk [vmem:[#allocation2] sm:$0x1] %vm130_vm1, %v1645_v2 }
 0x37a   :  { %v1651_v19 = vld [vmem:[#allocation2] sm:$0x1] }
 0x37b   :  { %v1652_v30 = vmul.f32 3.90625e-06, %v1651_v19 }
 0x37d   :  { %1653 = vst.msk [vmem:[#allocation15] sm:$0x1] %vm130_vm1, %v1652_v30 }
 0x37e   :  { %2214 = shalt.err (!%p2211_p4)
}
 0x37f   :  { %s2215_s26 = scalar_lea.hbm %s3066_s8, 16 }
 0x380   :  { %p2216_p5 = scmp.ne.s32.totalorder %s3066_s8, %s2215_s26  ;;  %p2219_p6 = scmp.lt.u32.totalorder %s2215_s26, %s3066_s8 }
 0x382   :  { %p2221_p7 = pnand %p2219_p6, %p2216_p5 }
 0x384   :  { %2224 = shalt.err (!%p2221_p7)
}
 0x385   :  { %1663 = dma.vmem_to_hbm [thread:$0]  %s1661_s7, 16, %s3066_s8, [#allocation5]  }
 0x386   :  { %2233 = dma.done.wait [#allocation5], 16  }
 0x387   :  { %2234 = vsyncadd [#allocation5], 4294967280 }
 0x388   :  { %1667 = vsyncpa [#allocation4], 1 }
 0x389   :  { %1668 = vsyncpa [#allocation7], 1 }
 0x38a   :  { %1669 = vsyncpa [#allocation10], 1 }
 0x38b   :  { %1670 = vsyncpa [#allocation13], 1 }
 0x38c   :  { %1671 = vsyncpa [#allocation5], 1 }

</bundles_post_ra>
